<compile_context>
chip_gen: v7x
topology: tpu7x:2x2x1
jax: 0.10.0
libtpu: 0.0.40
codegen_flags: <defaults>
</compile_context>

<pallas_src>
import functools

import jax
import jax.numpy as jnp
from jax.experimental import pallas as pl
from jax.experimental.pallas import tpu as pltpu


def _round_up(x, m):
    return (x + m - 1) // m * m


def _conv_taps(ewin_ref, w_ref, *, wpp, tm2):
    """3x3 conv on a halo'd kw-expanded window: 3 MXU taps, f32 accumulation.

    ewin_ref: (TM2 + 2*WPP, pack*CE) bf16  halo'd, kw-expanded, lane-packed input
    w_ref   : (3, pack*CE, pack*C_out) bf16  block-diagonal per-kh weights
    returns : (TM2, pack*C_out) f32
    """
    acc = jnp.zeros((tm2, w_ref.shape[-1]), jnp.float32)
    for kh in range(3):
        slab = ewin_ref[kh * wpp: kh * wpp + tm2, :]
        acc = acc + jnp.dot(slab, w_ref[kh],
                            preferred_element_type=jnp.float32)
    return acc


def _stats_kernel(mask_ref, ewin_ref, w_ref, st_ref, *, wpp, tm2, pack, c_out):
    """Pass 1: conv (recomputed, not stored) + masked BN partial statistics.

    mask_ref: (TM2, pack) f32  validity of each (packed) output row
    st_ref  : (1, 2*C_out) f32 lane-dense per-tile (sum | sum_sq) over valid rows
    """
    acc = _conv_taps(ewin_ref, w_ref, wpp=wpp, tm2=tm2)
    s = jnp.zeros((1, c_out), jnp.float32)
    ss = jnp.zeros((1, c_out), jnp.float32)
    for r in range(pack):
        yr = acc[:, r * c_out:(r + 1) * c_out]     # rows with lane residue r
        mr = mask_ref[:, r:r + 1]
        yrm = yr * mr
        s = s + jnp.sum(yrm, axis=0, keepdims=True)
        ss = ss + jnp.sum(yrm * yr, axis=0, keepdims=True)
    st_ref[...] = jnp.concatenate([s, ss], axis=1)


def _apply_kernel(ewin_ref, w_ref, sc_ref, o_ref, *, wpp, tm2):
    """Pass 2: recompute the conv taps and write the normalized output tile."""
    acc = _conv_taps(ewin_ref, w_ref, wpp=wpp, tm2=tm2)
    o_ref[...] = acc * sc_ref[0:1, :] + sc_ref[1:2, :]


def stem_forward(x_nchw, conv_w, gamma, beta, *, eps=1e-5, tile_m=4096,
                 data_format="NCHW"):
    """x_nchw: (N, C_in, H, W); conv_w: (C_out, C_in, 3, 3) (PyTorch layout)."""
    N, C_in, H, W = x_nchw.shape
    C_out = conv_w.shape[0]

    # ---- geometry --------------------------------------------------------
    # PACK consecutive output rows are interleaved along lanes so conv/BN
    # tiles are 128-lane dense (C_out=64 -> PACK=2 -> 128 lanes).
    pack = (128 // C_out) if (C_out <= 128 and 128 % C_out == 0) else 1
    pack = max(1, min(pack, 8))

    Hp = H + 2
    Wp = _round_up(W + 2, pack)          # padded width (multiple of PACK)
    S = Hp * Wp
    M = N * S                            # rows of the padded output grid
    CE = 3 * C_in                        # kw-expanded input channels

    # Tile: as large as requested, but keep >=2 grid steps when possible and
    # an even count (v7x shards the 1-D parallel grid across 2 TensorCores).
    TM = max(2 * Wp, min(tile_m, pl.cdiv(M, 2)))
    TM = _round_up(TM, 8 * pack)
    n_tiles = pl.cdiv(M, TM)
    if n_tiles > 1 and n_tiles % 2 == 1:
        TM = _round_up(max(2 * Wp, pl.cdiv(M, n_tiles + 1)), 8 * pack)
        n_tiles = pl.cdiv(M, TM)
    M_t = n_tiles * TM
    TM2 = TM // pack
    WPP = Wp // pack
    L = M_t + TM                         # flat rows incl. halo + tail padding
    HALO = Wp

    # ---- cheap layout glue (XLA; everything here is tiny vs the output) ---
    x = jnp.transpose(x_nchw, (0, 2, 3, 1)).astype(jnp.bfloat16)    # NHWC
    P = jnp.pad(x, ((0, 0), (1, 1), (1, Wp - W - 1), (0, 0)))       # (N,Hp,Wp,Ci)
    Pf = P.reshape(M, C_in)
    # kw expansion (3x of the small input): E[g, kw*C_in + ci] = Pf[g+kw-1, ci]
    Pfp = jnp.pad(Pf, ((1, 1), (0, 0)))
    E = jnp.concatenate([Pfp[0:M], Pfp[1:M + 1], Pfp[2:M + 2]], axis=1)
    Epad = jnp.pad(E, ((HALO, L - M - HALO), (0, 0)))
    Epad2 = Epad.reshape(L // pack, pack * CE)        # lane-packed view

    # Per-tile halo'd windows: only the 2*WPP halo rows per tile are duplicated
    # (E itself is only 3*C_in bf16 columns, so this stays tiny in HBM).
    main = Epad2[:n_tiles * TM2].reshape(n_tiles, TM2, pack * CE)
    halo = Epad2[TM2:(n_tiles + 1) * TM2].reshape(
        n_tiles, TM2, pack * CE)[:, :2 * WPP]
    Ewin = jnp.concatenate([main, halo], axis=1)      # (n_tiles, TM2+2WPP, P*CE)

    # Validity mask of each padded-grid output row (interior pixels only).
    fidx = jnp.arange(M_t, dtype=jnp.int32)
    rem = fidx % S
    ii = rem // Wp
    jj = rem % Wp
    valid = (fidx < M) & (ii >= 1) & (ii <= H) & (jj >= 1) & (jj <= W)
    mask2 = valid.astype(jnp.float32).reshape(M_t // pack, pack)

    # Weights: w[c,ci,kh,kw] -> wk[kh, kw*C_in+ci, c], block-diagonal over PACK.
    wk = jnp.transpose(conv_w, (2, 3, 1, 0)).reshape(3, CE, C_out)
    wbd = jnp.zeros((3, pack * CE, pack * C_out), jnp.float32)
    for r in range(pack):
        wbd = wbd.at[:, r * CE:(r + 1) * CE,
                     r * C_out:(r + 1) * C_out].set(wk)
    wbd = wbd.astype(jnp.bfloat16)

    cparams = pltpu.CompilerParams(
        dimension_semantics=("parallel",),
        vmem_limit_bytes=32 * 1024 * 1024,
    )

    # ---- pass 1: conv (MXU, not stored) + per-tile BN partial stats --------
    stats_kern = functools.partial(_stats_kernel, wpp=WPP, tm2=TM2,
                                   pack=pack, c_out=C_out)
    stats = pl.pallas_call(
        stats_kern,
        grid=(n_tiles,),
        in_specs=[
            pl.BlockSpec((TM2, pack), lambda t: (t, 0)),                  # mask
            pl.BlockSpec((None, TM2 + 2 * WPP, pack * CE),                # E win
                         lambda t: (t, 0, 0)),
            pl.BlockSpec((3, pack * CE, pack * C_out),                    # weights
                         lambda t: (0, 0, 0)),                            # resident
        ],
        out_specs=pl.BlockSpec((None, 1, 2 * C_out), lambda t: (t, 0, 0)),
        out_shape=jax.ShapeDtypeStruct((n_tiles, 1, 2 * C_out), jnp.float32),
        compiler_params=cparams,
    )(mask2, Ewin, wbd)

    # ---- finalize batch statistics (tiny XLA reduction) --------------------
    cnt = float(N * H * W)
    tot = jnp.sum(stats, axis=0)[0]                       # (2*C_out,)
    mean = tot[:C_out] / cnt
    var = jnp.maximum(tot[C_out:] / cnt - mean * mean, 0.0)   # biased variance
    inv_std = jax.lax.rsqrt(var + eps)
    scale = gamma.astype(jnp.float32) * inv_std
    shift = beta.astype(jnp.float32) - mean * scale
    sc = jnp.stack([jnp.tile(scale, pack), jnp.tile(shift, pack)])   # (2, P*C)

    # ---- pass 2: recompute conv taps + normalize, lane-dense output --------
    apply_kern = functools.partial(_apply_kernel, wpp=WPP, tm2=TM2)
    yn2 = pl.pallas_call(
        apply_kern,
        grid=(n_tiles,),
        in_specs=[
            pl.BlockSpec((None, TM2 + 2 * WPP, pack * CE),
                         lambda t: (t, 0, 0)),
            pl.BlockSpec((3, pack * CE, pack * C_out), lambda t: (0, 0, 0)),
            pl.BlockSpec((2, pack * C_out), lambda t: (0, 0)),
        ],
        out_specs=pl.BlockSpec((TM2, pack * C_out), lambda t: (t, 0)),
        out_shape=jax.ShapeDtypeStruct((M_t // pack, pack * C_out), jnp.float32),
        compiler_params=cparams,
    )(Ewin, wbd, sc)

    # ---- strip padded ring rows, back to requested layout -------------------
    y = yn2.reshape(M_t, C_out)[:M].reshape(N, Hp, Wp, C_out)
    y = y[:, 1:H + 1, 1:W + 1, :]
    if data_format == "NHWC":
        return y
    # TODO(synk): channels-last consumers should request NHWC (above) to drop
    # this extra crop+transpose HBM pass; fusing an in-kernel transpose into
    # pass 2 is the alternative for NCHW consumers.
    return jnp.transpose(y, (0, 3, 1, 2))


def _reference(x_nchw, conv_w, gamma, beta, eps=1e-5):
    """Pure-JAX reference (same bf16 input quantization, f32 accumulation)."""
    x = jnp.transpose(x_nchw, (0, 2, 3, 1)).astype(jnp.bfloat16)
    w = jnp.transpose(conv_w, (2, 3, 1, 0)).astype(jnp.bfloat16)   # HWIO
    y = jax.lax.conv_general_dilated(
        x, w, window_strides=(1, 1), padding="SAME",
        dimension_numbers=("NHWC", "HWIO", "NHWC"),
        preferred_element_type=jnp.float32)
    mean = jnp.mean(y, axis=(0, 1, 2))
    var = jnp.mean((y - mean) ** 2, axis=(0, 1, 2))
    yn = (y - mean) * jax.lax.rsqrt(var + eps) * gamma + beta
    return jnp.transpose(yn, (0, 3, 1, 2))


if __name__ == "__main__":
    key = jax.random.PRNGKey(0)
    k_x, k_w = jax.random.split(key)

    N, C_in, H, W = 2, 4, 16, 16
    C_out = 64

    x = jax.random.normal(k_x, (N, C_in, H, W), dtype=jnp.float32)
    fan_in = C_in * 9
    conv_w = jax.random.normal(k_w, (C_out, C_in, 3, 3), dtype=jnp.float32) / jnp.sqrt(
        jnp.float32(fan_in)
    )
    # BatchNorm2d default init: gamma=1, beta=0 (training-mode batch stats).
    gamma = jnp.ones((C_out,), dtype=jnp.float32)
    beta = jnp.zeros((C_out,), dtype=jnp.float32)

    out = jax.jit(stem_forward)(x, conv_w, gamma, beta)
    out = jax.block_until_ready(out)
    assert out.shape == (N, C_out, H, W)

    ref = jax.block_until_ready(_reference(x, conv_w, gamma, beta))
    max_err = float(jnp.max(jnp.abs(out - ref)))
    assert max_err < 5e-2, f"max abs err vs reference = {max_err}"

    print("KERNEL_OK")
</pallas_src>

<mosaic_0001>
module attributes {stable_mosaic.version = 11 : i64} {
  func.func @_stats_kernel(%arg0: i32, %arg1: memref<168x2xf32, #tpu.memory_space<vmem>>, %arg2: memref<1x186x24xbf16, #tpu.memory_space<vmem>>, %arg3: memref<3x24x128xbf16, #tpu.memory_space<vmem>>, %arg4: memref<1x1x128xf32, #tpu.memory_space<vmem>>) attributes {dimension_semantics = [#tpu.dimension_semantics<parallel>], iteration_bounds = array<i64: 2>, scalar_prefetch = 0 : i64, scratch_operands = 0 : i64, tpu.core_type = #tpu.core_type<tc>, window_params = [{transform_indices = @transform_0, window_bounds = array<i64: 168, 2>}, {transform_indices = @transform_1, window_bounds = array<i64: 1, 186, 24>}, {pipeline_mode = #tpu.pipeline_mode<synchronous>, transform_indices = @transform_2, window_bounds = array<i64: 3, 24, 128>}, {transform_indices = @transform_3, window_bounds = array<i64: 1, 1, 128>}]} {
    %cst = arith.constant 0.000000e+00 : f32
    %0 = vector.broadcast %cst : f32 to vector<168x128xf32>
    %c0 = arith.constant 0 : index
    %c0_0 = arith.constant 0 : index
    %c0_1 = arith.constant 0 : index
    %1 = vector.load %arg2[%c0, %c0_0, %c0_1] : memref<1x186x24xbf16, #tpu.memory_space<vmem>>, vector<1x168x24xbf16>
    %2 = vector.shape_cast %1 : vector<1x168x24xbf16> to vector<168x24xbf16>
    %c0_2 = arith.constant 0 : index
    %c0_3 = arith.constant 0 : index
    %c0_4 = arith.constant 0 : index
    %3 = vector.load %arg3[%c0_2, %c0_3, %c0_4] : memref<3x24x128xbf16, #tpu.memory_space<vmem>>, vector<1x24x128xbf16>
    %4 = vector.shape_cast %3 : vector<1x24x128xbf16> to vector<24x128xbf16>
    %cst_5 = arith.constant dense<0.000000e+00> : vector<168x128xf32>
    %5 = tpu.matmul %2, %4, %cst_5 {dimension_numbers = #tpu.dot_dimension_numbers<[1], [0], [0], [1], [0, 0, 1, 1], [], []>} : vector<168x24xbf16>, vector<24x128xbf16>, vector<168x128xf32> -> vector<168x128xf32>
    %6 = arith.addf %0, %5 : vector<168x128xf32>
    %c0_6 = arith.constant 0 : index
    %c9 = arith.constant 9 : index
    %c0_7 = arith.constant 0 : index
    %7 = vector.load %arg2[%c0_6, %c9, %c0_7] : memref<1x186x24xbf16, #tpu.memory_space<vmem>>, vector<1x168x24xbf16>
    %8 = vector.shape_cast %7 : vector<1x168x24xbf16> to vector<168x24xbf16>
    %c1 = arith.constant 1 : index
    %c0_8 = arith.constant 0 : index
    %c0_9 = arith.constant 0 : index
    %9 = vector.load %arg3[%c1, %c0_8, %c0_9] : memref<3x24x128xbf16, #tpu.memory_space<vmem>>, vector<1x24x128xbf16>
    %10 = vector.shape_cast %9 : vector<1x24x128xbf16> to vector<24x128xbf16>
    %cst_10 = arith.constant dense<0.000000e+00> : vector<168x128xf32>
    %11 = tpu.matmul %8, %10, %cst_10 {dimension_numbers = #tpu.dot_dimension_numbers<[1], [0], [0], [1], [0, 0, 1, 1], [], []>} : vector<168x24xbf16>, vector<24x128xbf16>, vector<168x128xf32> -> vector<168x128xf32>
    %12 = arith.addf %6, %11 : vector<168x128xf32>
    %c0_11 = arith.constant 0 : index
    %c18 = arith.constant 18 : index
    %c0_12 = arith.constant 0 : index
    %13 = vector.load %arg2[%c0_11, %c18, %c0_12] : memref<1x186x24xbf16, #tpu.memory_space<vmem>>, vector<1x168x24xbf16>
    %14 = vector.shape_cast %13 : vector<1x168x24xbf16> to vector<168x24xbf16>
    %c2 = arith.constant 2 : index
    %c0_13 = arith.constant 0 : index
    %c0_14 = arith.constant 0 : index
    %15 = vector.load %arg3[%c2, %c0_13, %c0_14] : memref<3x24x128xbf16, #tpu.memory_space<vmem>>, vector<1x24x128xbf16>
    %16 = vector.shape_cast %15 : vector<1x24x128xbf16> to vector<24x128xbf16>
    %cst_15 = arith.constant dense<0.000000e+00> : vector<168x128xf32>
    %17 = tpu.matmul %14, %16, %cst_15 {dimension_numbers = #tpu.dot_dimension_numbers<[1], [0], [0], [1], [0, 0, 1, 1], [], []>} : vector<168x24xbf16>, vector<24x128xbf16>, vector<168x128xf32> -> vector<168x128xf32>
    %18 = arith.addf %12, %17 : vector<168x128xf32>
    %cst_16 = arith.constant 0.000000e+00 : f32
    %19 = vector.broadcast %cst_16 : f32 to vector<1x64xf32>
    %cst_17 = arith.constant 0.000000e+00 : f32
    %20 = vector.broadcast %cst_17 : f32 to vector<1x64xf32>
    %21 = vector.extract_strided_slice %18 {offsets = [0, 0], sizes = [168, 64], strides = [1, 1]} : vector<168x128xf32> to vector<168x64xf32>
    %c0_18 = arith.constant 0 : index
    %c0_19 = arith.constant 0 : index
    %22 = vector.load %arg1[%c0_18, %c0_19] : memref<168x2xf32, #tpu.memory_space<vmem>>, vector<168x1xf32>
    %23 = vector.broadcast %22 : vector<168x1xf32> to vector<168x64xf32>
    %24 = arith.mulf %21, %23 : vector<168x64xf32>
    %cst_20 = arith.constant dense<0.000000e+00> : vector<64xf32>
    %25 = vector.multi_reduction <add>, %24, %cst_20 [0] : vector<168x64xf32> to vector<64xf32>
    %26 = vector.shape_cast %25 : vector<64xf32> to vector<1x64xf32>
    %27 = arith.addf %19, %26 : vector<1x64xf32>
    %28 = arith.mulf %24, %21 : vector<168x64xf32>
    %cst_21 = arith.constant dense<0.000000e+00> : vector<64xf32>
    %29 = vector.multi_reduction <add>, %28, %cst_21 [0] : vector<168x64xf32> to vector<64xf32>
    %30 = vector.shape_cast %29 : vector<64xf32> to vector<1x64xf32>
    %31 = arith.addf %20, %30 : vector<1x64xf32>
    %32 = vector.extract_strided_slice %18 {offsets = [0, 64], sizes = [168, 64], strides = [1, 1]} : vector<168x128xf32> to vector<168x64xf32>
    %c0_22 = arith.constant 0 : index
    %c1_23 = arith.constant 1 : index
    %33 = vector.load %arg1[%c0_22, %c1_23] : memref<168x2xf32, #tpu.memory_space<vmem>>, vector<168x1xf32>
    %34 = vector.broadcast %33 : vector<168x1xf32> to vector<168x64xf32>
    %35 = arith.mulf %32, %34 : vector<168x64xf32>
    %cst_24 = arith.constant dense<0.000000e+00> : vector<64xf32>
    %36 = vector.multi_reduction <add>, %35, %cst_24 [0] : vector<168x64xf32> to vector<64xf32>
    %37 = vector.shape_cast %36 : vector<64xf32> to vector<1x64xf32>
    %38 = arith.addf %27, %37 : vector<1x64xf32>
    %39 = arith.mulf %35, %32 : vector<168x64xf32>
    %cst_25 = arith.constant dense<0.000000e+00> : vector<64xf32>
    %40 = vector.multi_reduction <add>, %39, %cst_25 [0] : vector<168x64xf32> to vector<64xf32>
    %41 = vector.shape_cast %40 : vector<64xf32> to vector<1x64xf32>
    %42 = arith.addf %31, %41 : vector<1x64xf32>
    %43 = tpu.concatenate %38, %42 in 1 : vector<1x64xf32>, vector<1x64xf32> -> vector<1x128xf32>
    %c0_26 = arith.constant 0 : index
    %c0_27 = arith.constant 0 : index
    %c0_28 = arith.constant 0 : index
    %44 = vector.load %arg4[%c0_26, %c0_27, %c0_28] : memref<1x1x128xf32, #tpu.memory_space<vmem>>, vector<1x1x128xf32>
    %45 = vector.shape_cast %44 : vector<1x1x128xf32> to vector<1x128xf32>
    %46 = vector.shape_cast %43 : vector<1x128xf32> to vector<1x1x128xf32>
    tpu.vector_store %arg4[%c0_26, %c0_27, %c0_28], %46 {strides = array<i32>} : memref<1x1x128xf32, #tpu.memory_space<vmem>>, vector<1x1x128xf32>,
    return
  }
  func.func @transform_0(%arg0: i32) -> (i32, i32) {
    %c0_i32 = arith.constant 0 : i32
    %c0_i32_0 = arith.constant 0 : i32
    return %arg0, %c0_i32 : i32, i32
  }
  func.func @transform_1(%arg0: i32) -> (i32, i32, i32) {
    %c0_i32 = arith.constant 0 : i32
    %c0_i32_0 = arith.constant 0 : i32
    %c0_i32_1 = arith.constant 0 : i32
    return %arg0, %c0_i32, %c0_i32_0 : i32, i32, i32
  }
  func.func @transform_2(%arg0: i32) -> (i32, i32, i32) {
    %c0_i32 = arith.constant 0 : i32
    %c0_i32_0 = arith.constant 0 : i32
    %c0_i32_1 = arith.constant 0 : i32
    %c0_i32_2 = arith.constant 0 : i32
    return %c0_i32, %c0_i32_0, %c0_i32_1 : i32, i32, i32
  }
  func.func @transform_3(%arg0: i32) -> (i32, i32, i32) {
    %c0_i32 = arith.constant 0 : i32
    %c0_i32_0 = arith.constant 0 : i32
    %c0_i32_1 = arith.constant 0 : i32
    return %arg0, %c0_i32, %c0_i32_0 : i32, i32, i32
  }
}

module attributes {stable_mosaic.version = 11 : i64} {
  func.func @_apply_kernel(%arg0: i32, %arg1: memref<1x186x24xbf16, #tpu.memory_space<vmem>>, %arg2: memref<3x24x128xbf16, #tpu.memory_space<vmem>>, %arg3: memref<2x128xf32, #tpu.memory_space<vmem>>, %arg4: memref<168x128xf32, #tpu.memory_space<vmem>>) attributes {dimension_semantics = [#tpu.dimension_semantics<parallel>], iteration_bounds = array<i64: 2>, scalar_prefetch = 0 : i64, scratch_operands = 0 : i64, tpu.core_type = #tpu.core_type<tc>, window_params = [{transform_indices = @transform_0, window_bounds = array<i64: 1, 186, 24>}, {pipeline_mode = #tpu.pipeline_mode<synchronous>, transform_indices = @transform_1, window_bounds = array<i64: 3, 24, 128>}, {pipeline_mode = #tpu.pipeline_mode<synchronous>, transform_indices = @transform_2, window_bounds = array<i64: 2, 128>}, {transform_indices = @transform_3, window_bounds = array<i64: 168, 128>}]} {
    %cst = arith.constant 0.000000e+00 : f32
    %0 = vector.broadcast %cst : f32 to vector<168x128xf32>
    %c0 = arith.constant 0 : index
    %c0_0 = arith.constant 0 : index
    %c0_1 = arith.constant 0 : index
    %1 = vector.load %arg1[%c0, %c0_0, %c0_1] : memref<1x186x24xbf16, #tpu.memory_space<vmem>>, vector<1x168x24xbf16>
    %2 = vector.shape_cast %1 : vector<1x168x24xbf16> to vector<168x24xbf16>
    %c0_2 = arith.constant 0 : index
    %c0_3 = arith.constant 0 : index
    %c0_4 = arith.constant 0 : index
    %3 = vector.load %arg2[%c0_2, %c0_3, %c0_4] : memref<3x24x128xbf16, #tpu.memory_space<vmem>>, vector<1x24x128xbf16>
    %4 = vector.shape_cast %3 : vector<1x24x128xbf16> to vector<24x128xbf16>
    %cst_5 = arith.constant dense<0.000000e+00> : vector<168x128xf32>
    %5 = tpu.matmul %2, %4, %cst_5 {dimension_numbers = #tpu.dot_dimension_numbers<[1], [0], [0], [1], [0, 0, 1, 1], [], []>} : vector<168x24xbf16>, vector<24x128xbf16>, vector<168x128xf32> -> vector<168x128xf32>
    %6 = arith.addf %0, %5 : vector<168x128xf32>
    %c0_6 = arith.constant 0 : index
    %c9 = arith.constant 9 : index
    %c0_7 = arith.constant 0 : index
    %7 = vector.load %arg1[%c0_6, %c9, %c0_7] : memref<1x186x24xbf16, #tpu.memory_space<vmem>>, vector<1x168x24xbf16>
    %8 = vector.shape_cast %7 : vector<1x168x24xbf16> to vector<168x24xbf16>
    %c1 = arith.constant 1 : index
    %c0_8 = arith.constant 0 : index
    %c0_9 = arith.constant 0 : index
    %9 = vector.load %arg2[%c1, %c0_8, %c0_9] : memref<3x24x128xbf16, #tpu.memory_space<vmem>>, vector<1x24x128xbf16>
    %10 = vector.shape_cast %9 : vector<1x24x128xbf16> to vector<24x128xbf16>
    %cst_10 = arith.constant dense<0.000000e+00> : vector<168x128xf32>
    %11 = tpu.matmul %8, %10, %cst_10 {dimension_numbers = #tpu.dot_dimension_numbers<[1], [0], [0], [1], [0, 0, 1, 1], [], []>} : vector<168x24xbf16>, vector<24x128xbf16>, vector<168x128xf32> -> vector<168x128xf32>
    %12 = arith.addf %6, %11 : vector<168x128xf32>
    %c0_11 = arith.constant 0 : index
    %c18 = arith.constant 18 : index
    %c0_12 = arith.constant 0 : index
    %13 = vector.load %arg1[%c0_11, %c18, %c0_12] : memref<1x186x24xbf16, #tpu.memory_space<vmem>>, vector<1x168x24xbf16>
    %14 = vector.shape_cast %13 : vector<1x168x24xbf16> to vector<168x24xbf16>
    %c2 = arith.constant 2 : index
    %c0_13 = arith.constant 0 : index
    %c0_14 = arith.constant 0 : index
    %15 = vector.load %arg2[%c2, %c0_13, %c0_14] : memref<3x24x128xbf16, #tpu.memory_space<vmem>>, vector<1x24x128xbf16>
    %16 = vector.shape_cast %15 : vector<1x24x128xbf16> to vector<24x128xbf16>
    %cst_15 = arith.constant dense<0.000000e+00> : vector<168x128xf32>
    %17 = tpu.matmul %14, %16, %cst_15 {dimension_numbers = #tpu.dot_dimension_numbers<[1], [0], [0], [1], [0, 0, 1, 1], [], []>} : vector<168x24xbf16>, vector<24x128xbf16>, vector<168x128xf32> -> vector<168x128xf32>
    %18 = arith.addf %12, %17 : vector<168x128xf32>
    %c0_16 = arith.constant 0 : index
    %c0_17 = arith.constant 0 : index
    %19 = vector.load %arg3[%c0_16, %c0_17] : memref<2x128xf32, #tpu.memory_space<vmem>>, vector<1x128xf32>
    %20 = vector.broadcast %19 : vector<1x128xf32> to vector<168x128xf32>
    %21 = arith.mulf %18, %20 : vector<168x128xf32>
    %c1_18 = arith.constant 1 : index
    %c0_19 = arith.constant 0 : index
    %22 = vector.load %arg3[%c1_18, %c0_19] : memref<2x128xf32, #tpu.memory_space<vmem>>, vector<1x128xf32>
    %23 = vector.broadcast %22 : vector<1x128xf32> to vector<168x128xf32>
    %24 = arith.addf %21, %23 : vector<168x128xf32>
    %c0_20 = arith.constant 0 : index
    %c0_21 = arith.constant 0 : index
    %25 = vector.load %arg4[%c0_20, %c0_21] : memref<168x128xf32, #tpu.memory_space<vmem>>, vector<168x128xf32>
    tpu.vector_store %arg4[%c0_20, %c0_21], %24 {strides = array<i32>} : memref<168x128xf32, #tpu.memory_space<vmem>>, vector<168x128xf32>,
    return
  }
  func.func @transform_0(%arg0: i32) -> (i32, i32, i32) {
    %c0_i32 = arith.constant 0 : i32
    %c0_i32_0 = arith.constant 0 : i32
    %c0_i32_1 = arith.constant 0 : i32
    return %arg0, %c0_i32, %c0_i32_0 : i32, i32, i32
  }
  func.func @transform_1(%arg0: i32) -> (i32, i32, i32) {
    %c0_i32 = arith.constant 0 : i32
    %c0_i32_0 = arith.constant 0 : i32
    %c0_i32_1 = arith.constant 0 : i32
    %c0_i32_2 = arith.constant 0 : i32
    return %c0_i32, %c0_i32_0, %c0_i32_1 : i32, i32, i32
  }
  func.func @transform_2(%arg0: i32) -> (i32, i32) {
    %c0_i32 = arith.constant 0 : i32
    %c0_i32_0 = arith.constant 0 : i32
    %c0_i32_1 = arith.constant 0 : i32
    return %c0_i32, %c0_i32_0 : i32, i32
  }
  func.func @transform_3(%arg0: i32) -> (i32, i32) {
    %c0_i32 = arith.constant 0 : i32
    %c0_i32_0 = arith.constant 0 : i32
    return %arg0, %c0_i32 : i32, i32
  }
}

</mosaic_0001>

<bundles_post_ra>
// kernel: tile.17
= control target key start
LH: loop header
LB: loop body
LE: loop exit
PB: predicated region body
PF: predicated region fallthrough
CT: control target
= control target key end

     0   :  { %s22_s0 = inlined_call_operand.vmem [shape: f32[64], index: 0, kind: input, shape index: {}]   ;;  %s23_s1 = inlined_call_operand.vmem [shape: f32[2,64], index: 1, kind: output, shape index: {}]  }
   0x1   :  { %v4_v0 = vld [vmem:[%s22_s0] ss:$0 sm:$0xff] }
   0x2   :  { %5 = vst [vmem:[%s23_s1] sm:$0x3] %v4_v0 }

// kernel: tile.19
= control target key start
LH: loop header
LB: loop body
LE: loop exit
PB: predicated region body
PF: predicated region fallthrough
CT: control target
= control target key end

     0   :  { %vm7_vm0 = vcmask 523264   ;;  %vm13_vm1 = vcmask 1048064   ;;  %s39_s0 = inlined_call_operand.vmem [shape: f32[2,64], index: 0, kind: input, shape index: {}]   ;;  %s40_s1 = inlined_call_operand.vmem [shape: f32[1,128], index: 1, kind: output, shape index: {}]  }
   0x1   :  { %v4_v0 = vld [vmem:[%s39_s0] sm:$0x3]  ;;  %s22_s0 = smov 64  }
   0x2   :  { %5 = vst [vmem:[#allocation1] sm:$0x3] %v4_v0 }
   0x9   :  { %v10_v1 = vld [vmem:[#allocation1 + $0x1] sm:$0x1]   ;;  %v6_v2 = vld [vmem:[#allocation1] sm:$0x1]  }
   0xa   :  { %11 = vrot.lane.b32.xlu0 %v10_v1, %s22_s0  ;;  %8 = vst.msk [vmem:[#allocation0] sm:$0x1] %vm7_vm0, %v6_v2  }
  0x7c   :  { %v12_v3 = vpop.permute.xlu0 %11  }
  0x7d   :  { %14 = vst.msk [vmem:[#allocation0] sm:$0x1] %vm13_vm1, %v12_v3  }
  0x84   :  { %v18_v4 = vld [vmem:[#allocation0] sm:$0x1] }
  0x85   :  { %20 = vst [vmem:[%s40_s1] sm:$0x1] %v18_v4 }

// kernel: stem_forward.2
= control target key start
LH: loop header
LB: loop body
LE: loop exit
PB: predicated region body
PF: predicated region fallthrough
CT: control target
= control target key end

     0   :  { %s1988_s12 = smov 0   ;;  %s2590_s0 = inlined_call_operand.vmem [shape: f32[336,2], index: 0, kind: input, shape index: {}]   ;;  %s2591_s1 = inlined_call_operand.vmem [shape: bf16[2,186,24], index: 1, kind: input, shape index: {}]   ;;  %s2592_s2 = inlined_call_operand.vmem [shape: bf16[3,24,128], index: 2, kind: input, shape index: {}]   ;;  %s2593_s3 = inlined_call_operand.vmem [shape: f32[2,1,128], index: 3, kind: output, shape index: {}]  }
   0x1 LB: > { %s1994_s13 = sadd.s32 4294967295, %s1961_s12   ;;  %p1562_p0 = scmp.ge.s32.totalorder %s1961_s12, 1  ;;  %s1961_s12 = sphi %s1988_s12, %s13_s12  }
   0x2   : > { %p148_p1 = scmp.lt.s32.totalorder %s1961_s12, 3 }
   0x4   : > { %p149_p2 = pnand %p1562_p0, %p148_p1 }
   0x5   : > { %v2001_v0 = vld [vmem:[%s2592_s2] sm:$0xff] (!%p149_p2)   ;;  %v1963_v1 = vmov (!%p149_p2), 0.0   ;;  %vm406_vm0 = vcmask (!%p149_p2), 1043456   ;;  %v1917_v2 = vld [vmem:[%s2592_s2 + $0x8] ss:$0 sps:$4 sm:$0xff] (!%p149_p2)   ;;  %vm1964_vm1 = vmmov (!%p149_p2), 0  }
   0x6   : > { %152 = sbr.rel (%p149_p2) target bundleno = 617 (0x269), region = 32  ;;  %1732 = vmatprep.subr.bf16.mxu0 (!%p149_p2), %v1963_v1  ;;  %1684 = vmatprep.subr.bf16.mxu1 (!%p149_p2), %v1963_v1  ;;  %v1918_v3 = vld [vmem:[%s2592_s2 + $0xc] sm:$0xff] (!%p149_p2)   ;;  %p181_p3 = scmp.lt.s32.totalorder (!%p149_p2), %s1994_s13, 1  ;;  %v2017_v4 = vsel (!%p149_p2), %vm406_vm0, %v1917_v2, 0  ;;  %v1922_v5 = vld [vmem:[%s2592_s2 + $0x14] ss:$0 sps:$4 sm:$0xff] (!%p149_p2)  }
   0x7   : > { %1733 = vmatpush3.bf16.msra.mxu0 (!%p149_p2), %v2001_v0  ;;  %1736 = vmatprep.mubr.msk.bf16.mxu0 (!%p149_p2), %vm1964_vm1, %v1963_v1  ;;  %v408_v6 = vsel (!%p149_p2), %vm406_vm0, %v1922_v5, 0  ;;  %v1965_v7 = vmov (!%p149_p2), 1   ;;  %vm372_vm2 = vcmask (!%p149_p2), 195584   ;;  %v1921_v8 = vld [vmem:[%s2592_s2 + $0x18] sm:$0xff] (!%p149_p2)   ;;  %v1929_v9 = vld [vmem:[%s2592_s2 + $0x20] ss:$0 sps:$4 sm:$0xff] (!%p149_p2)  }
   0x8   : > { %1734 = vmatprep.subr.bf16.mxu0 (!%p149_p2), %v1963_v1  ;;  %1688 = vmatprep.mubr.msk.bf16.mxu1 (!%p149_p2), %vm1964_vm1, %v1963_v1  ;;  %v854_v25 = vsel (!%p149_p2), %vm406_vm0, %v1929_v9, 0  ;;  %vm275_vm3 = vsmask.f32 (!%p149_p2), 7424  ;;  %s175_s4 = smul.u32 (!%p149_p2), 21, %s1994_s13  ;;  %vm789_vm4 = vcmask (!%p149_p2), 1046528   ;;  %vm1367_vm5 = vcmask (!%p149_p2), 1048064  }
   0x9   : > { %1685 = vmatpush3.bf16.msra.mxu1 (!%p149_p2), %v1918_v3  ;;  %1911 = vset.pattern.permute.xlu0 (!%p149_p2), %v1965_v7  ;;  %vm1144_vm6 = vcmask (!%p149_p2), 523264   ;;  %s1967_s9 = smov (!%p149_p2), 64  }
   0xa   : > { %1686 = vmatprep.subr.bf16.mxu1 (!%p149_p2), %v1963_v1  ;;  %1912 = vset.pattern.permute.xlu1 (!%p149_p2), %v1965_v7  ;;  %p176_p4 = scmp.lt.s32.totalorder (!%p149_p2), %s175_s4, 41 }
   0xb   : > { %1735 = vmatpush3.bf16.msra.mxu0 (!%p149_p2), %v2017_v4 }
   0xc   : > { %1780 = vmatprep.subr.bf16.mxu0 (!%p149_p2), %v1963_v1 }
   0xd   : > { %s2022_s20 = scalar_select %p181_p3, %s1994_s13, 1  ;;  %1687 = vmatpush3.bf16.msra.mxu1 %v408_v6 }
   0xe   : > { %1828 = vmatprep.subr.bf16.mxu1 %v1963_v1  ;;  %s2595_s4 = smov (!%p176_p4, %s175_s4), 41 }
   0xf   : > { %s1897_s23 = smul.u32 96, %s2022_s20  ;;  %s1563_s5 = sshll.u32 %s2595_s4, 3 }
  0x10   : > { %s2147_s8 = scalar_lea.vmem %s2590_s0, %s1563_s5  ;;  %s188_s13 = scalar_lea.vmem %s2593_s3, %s2022_s20 }
  0x11   : > { %s2036_s26 = scalar_lea.vmem %s2591_s1, %s1897_s23 }
  0x12   : > { %v190_v10 = vld [vmem:[%s2036_s26] sm:$0xf]  ;;  %v191_v11 = vld [vmem:[%s2036_s26 + $0x4] sm:$0xf]  ;;  %v192_v12 = vld [vmem:[%s2036_s26 + $0x8] sm:$0xf] }
  0x13   : > { %v1568_v13 = vcombine.low %v191_v11, %v192_v12  ;;  %v1592_v14 = vcombine.low %v190_v10, %v191_v11  ;;  %v193_v15 = vld [vmem:[%s2036_s26 + $0xc] sm:$0xf]  ;;  %v194_v16 = vld [vmem:[%s2036_s26 + $0x10] sm:$0xf]  ;;  %v195_v17 = vld [vmem:[%s2036_s26 + $0x14] sm:$0xf] }
  0x14   : > { %v1569_v18 = vcombine.low %v193_v15, %v194_v16  ;;  %v2053_v19 = vld [vmem:[%s2036_s26 + $0x18] sm:$0xf]  ;;  %v2062_v27 = vld [vmem:[%s2036_s26 + $0x1c] sm:$0xf]  ;;  %v1593_v29 = vcombine.low %v192_v12, %v193_v15  ;;  %v2065_v32 = vld [vmem:[%s2036_s26 + $0x20] sm:$0xf]  ;;  %v1594_v40 = vcombine.low %v194_v16, %v195_v17 }
  0x15   : > { %1737 = vmatmul.mubr.msk.bf16.vlgmr.msra.gmra.mrb[0].mxu0 %vm372_vm2, %v1592_v14  ;;  %v277_v20 = vshrl.u32 %v1568_v13, 16  ;;  %v279_v21 = vshll.u32 %v1568_v13, 16  ;;  %v1570_v22 = vcombine.low %v195_v17, %v2053_v19  ;;  %v1571_v36 = vcombine.low %v2062_v27, %v2065_v32  ;;  %v2074_v37 = vld [vmem:[%s2036_s26 + $0x44] sm:$0xf]  ;;  %v2081_v38 = vld [vmem:[%s2036_s26 + $0x48] sm:$0xf] }
  0x16   : > { %1781 = vmatpush3.bf16.msra.mxu0 %v1921_v8  ;;  %v284_v23 = vshll.u32 %v1569_v18, 16  ;;  %1740 = vmatprep.mubr.msk.bf16.mxu0 %vm1964_vm1, %v1963_v1  ;;  %v288_v30 = vshrl.u32 %v1569_v18, 16  ;;  %v2085_v39 = vld [vmem:[%s2036_s26 + $0x24] sm:$0xf]  ;;  %v2089_v41 = vld [vmem:[%s2036_s26 + $0x28] sm:$0xf]  ;;  %v1576_v42 = vcombine.low %v2074_v37, %v2081_v38 }
  0x17   : > { %v281_v24 = vrot.slane %v279_v21, 1  ;;  %1782 = vmatprep.subr.bf16.mxu0 %v1963_v1  ;;  %v292_v31 = vshll.u32 %v1570_v22, 16  ;;  %v2094_v43 = vld [vmem:[%s2036_s26 + $0x4c] sm:$0xf]  ;;  %v2097_v44 = vld [vmem:[%s2036_s26 + $0x50] sm:$0xf]  ;;  %v1572_v53 = vcombine.low %v2085_v39, %v2089_v41 }
  0x18   : > { %v286_v26 = vrot.slane %v284_v23, 1  ;;  %v296_v46 = vshrl.u32 %v1570_v22, 16  ;;  %v300_v47 = vshll.u32 %v1571_v36, 16  ;;  %v1577_v48 = vcombine.low %v2094_v43, %v2097_v44  ;;  %v2104_v52 = vld [vmem:[%s2036_s26 + $0x54] sm:$0x1f]   ;;  %v2125_v63 = vld [vmem:[%s2036_s26 + $0x48] sm:$0xff]  }
  0x19   : > { %v282_v28 = vor.u32 %v281_v24, %v277_v20  ;;  %v294_v35 = vrot.slane %v292_v31, 1  ;;  %v340_v49 = vshll.u32 %v1576_v42, 16  ;;  %v344_v50 = vshrl.u32 %v1576_v42, 16  ;;  %v2130_v2 = vld [vmem:[%s2036_s26 + $0x2c] sm:$0xf]  ;;  %v1951_v10 = vld [vmem:[%s2036_s26 + $0x50] sm:$0xff]  }
  0x1a   : > { %1783 = vmatpush3.bf16.msra.mxu0 %v854_v25  ;;  %v290_v34 = vor.u32 %v288_v30, %v286_v26  ;;  %v348_v51 = vshll.u32 %v1577_v48, 16  ;;  %v352_v55 = vshrl.u32 %v1577_v48, 16  ;;  %v302_v57 = vrot.slane %v300_v47, 1  ;;  %v2133_v3 = vld [vmem:[%s2036_s26 + $0x30] sm:$0xf]  ;;  %v2153_v12 = vld [vmem:[%s2147_s8] sm:$0xff] }
  0x1b   : > { %v287_v33 = vsel %vm275_vm3, %v282_v28, %v286_v26  ;;  %v2109_v54 = vrot.slane %v340_v49, 1  ;;  %v298_v56 = vor.u32 %v296_v46, %v294_v35  ;;  %v356_v59 = vshll.u32 %v2104_v52, 16  ;;  %v2150_v11 = vld [vmem:[%s2036_s26 + $0x58] sm:$0x1f]   ;;  %v2156_v13 = vld [vmem:[%s2147_s8 + $0x10] sm:$0xff]  ;;  %1263 = vperm.xlu0 %1911, %v2153_v12   ;;  %v2168_v20 = vld [vmem:[%s2147_s8 + $0x8] sm:$0xff] }
  0x1c   : > { %1689 = vmatmul.mubr.msk.bf16.vlgmr.msra.gmra.mrb[0].mxu1 %vm372_vm2, %v287_v33  ;;  %v295_v45 = vsel %vm275_vm3, %v290_v34, %v294_v35  ;;  %v350_v58 = vrot.slane %v348_v51, 1  ;;  %v304_v6 = vshrl.u32 %v1571_v36, 16  ;;  %v308_v8 = vshll.u32 %v1572_v53, 16  ;;  %1271 = vperm.xlu1 %1912, %v2156_v13   ;;  %v2184_v23 = vld [vmem:[%s2147_s8 + $0x18] sm:$0xff]  ;;  %v2191_v28 = vld [vmem:[%s2147_s8 + $0x20] sm:$0xff]  ;;  %v2201_v31 = vld [vmem:[%s2147_s8 + $0x28] sm:$0xff] }
  0x1d   : > { %1741 = vmatmul.mubr.msk.bf16.gmra.mrb[4].mxu0 %vm372_vm2, %v1593_v29  ;;  %1830 = vmatpush3.bf16.msra.mxu1 %v2001_v0  ;;  %v346_v60 = vor.u32 %v344_v50, %v2109_v54  ;;  %v2120_v62 = vrot.slane %v356_v59, 1  ;;  %v1595_v0 = vcombine.low %v2053_v19, %v2062_v27  ;;  %v303_v5 = vsel %vm275_vm3, %v298_v56, %v302_v57  ;;  %v2194_v29 = vld [vmem:[%s2036_s26 + $0x34] sm:$0xf]  ;;  %v2197_v30 = vld [vmem:[%s2036_s26 + $0x38] sm:$0xf]  ;;  %v2225_v47 = vld [vmem:[%s2147_s8 + $0x40] sm:$0xff] }
  0x1e   : > { %1692 = vmatprep.mubr.msk.bf16.mxu1 %vm1964_vm1, %v1963_v1  ;;  %1744 = vmatprep.mubr.msk.bf16.mxu0 %vm1964_vm1, %v1963_v1  ;;  %v354_v61 = vor.u32 %v352_v55, %v350_v58  ;;  %v805_v14 = vrot.slane %v2125_v63, 1  ;;  %v807_v15 = vrot.slane %v1951_v10, 1  ;;  %v809_v16 = vrot.slane %v2150_v11, 1  ;;  %v2211_v35 = vld [vmem:[%s2147_s8 + $0x30] sm:$0xff]  ;;  %v2217_v36 = vld [vmem:[%s2147_s8 + $0x38] sm:$0xff]  ;;  %v2236_v51 = vld [vmem:[%s2147_s8 + $0x48] sm:$0xff] }
  0x1f   : > { %1829 = vmatprep.subr.bf16.mxu1 %v1963_v1  ;;  %v306_v17 = vor.u32 %v304_v6, %v302_v57  ;;  %v310_v18 = vrot.slane %v308_v8, 1  ;;  %v1573_v19 = vcombine.low %v2130_v2, %v2133_v3  ;;  %1267 = vperm.xlu0 %1911, %v2168_v20   ;;  %v1596_v25 = vcombine.low %v2065_v32, %v2085_v39  ;;  %v1937_v46 = vld [vmem:[%s2036_s26 + $0x10] sm:$0xff]   ;;  %v1936_v48 = vld [vmem:[%s2036_s26 + $0x8] sm:$0xfe]   ;;  %v2229_v49 = vld [vmem:[%s2036_s26 + $0x3c] sm:$0xf] }
  0x20   : > { %v2141_v9 = vsel %vm275_vm3, %v354_v61, %v2120_v62  ;;  %v2173_v21 = vsel %vm789_vm4, %v805_v14, %v807_v15  ;;  %v2181_v22 = vsel %vm789_vm4, %v807_v15, %v809_v16  ;;  %v312_v26 = vshrl.u32 %v1572_v53, 16  ;;  %1275 = vperm.xlu1 %1912, %v2184_v23   ;;  %v2232_v50 = vld [vmem:[%s2036_s26 + $0x40] sm:$0xf]  ;;  %v2246_v56 = vld [vmem:[%s2147_s8 + $0x50] sm:$0xff]  ;;  %v2252_v59 = vld [vmem:[%s2147_s8 + $0x58] sm:$0xff] }
  0x21   : > { %1831 = vmatpush3.bf16.msra.mxu1 %v2017_v4  ;;  %v2136_v4 = vsel %vm275_vm3, %v346_v60, %v350_v58  ;;  %v311_v24 = vsel %vm275_vm3, %v306_v17, %v310_v18  ;;  %v316_v27 = vshll.u32 %v1573_v19, 16  ;;  %v1574_v34 = vcombine.low %v2194_v29, %v2197_v30  ;;  %v1939_v6 = vld [vmem:[%s2036_s26 + $0x18] sm:$0xff]   ;;  %v2263_v8 = vld [vmem:[%s2147_s8 + $0x68] sm:$0xff]  ;;  %v2271_v17 = vld [vmem:[%s2147_s8 + $0x70] sm:$0xff] }
  0x22   : > { %v314_v32 = vor.u32 %v312_v26, %v310_v18  ;;  %v320_v42 = vshrl.u32 %v1573_v19, 16  ;;  %v1575_v55 = vcombine.low %v2229_v49, %v2232_v50  ;;  %v790_v57 = vrot.slane %v1936_v48, 1  ;;  %v2277_v19 = vld [vmem:[%s2147_s8 + $0x78] sm:$0xff]  ;;  %v2282_v26 = vld [vmem:[%s2147_s8 + $0x80] sm:$0xff] }
  0x23   : > { %1279 = vperm.xlu0 %1911, %v2191_v28   ;;  %v318_v33 = vrot.slane %v316_v27, 1  ;;  %v791_v58 = vrot.slane %v1937_v46, 1  ;;  %v328_v61 = vshrl.u32 %v1574_v34, 16  ;;  %v793_v18 = vrot.slane %v1939_v6, 1  ;;  %v2308_v46 = vld [vmem:[%s2147_s8 + $0xa0] sm:$0xff] }
  0x24   : > { %1693 = vmatmul.mubr.msk.bf16.gmra.mrb[4].mxu1 %vm372_vm2, %v295_v45  ;;  %1283 = vperm.xlu1 %1912, %v2201_v31   ;;  %v324_v45 = vshll.u32 %v1574_v34, 16  ;;  %v1600_v63 = vcombine.low %v2232_v50, %v2074_v37 }
  0x25   : > { %1745 = vmatmul.mubr.msk.bf16.gmra.mrb[8].mxu0 %vm372_vm2, %v1594_v40  ;;  %1696 = vmatprep.mubr.msk.bf16.mxu1 %vm1964_vm1, %v1963_v1  ;;  %v319_v39 = vsel %vm275_vm3, %v314_v32, %v318_v33  ;;  %v1597_v40 = vcombine.low %v2089_v41, %v2130_v2  ;;  %v322_v41 = vor.u32 %v320_v42, %v318_v33  ;;  %v2257_v2 = vld [vmem:[%s2147_s8 + $0x60] sm:$0xff]  ;;  %v2288_v33 = vld [vmem:[%s2147_s8 + $0x88] sm:$0xff]  ;;  %v2302_v42 = vld [vmem:[%s2147_s8 + $0x98] sm:$0xff] }
  0x26   : > { %1748 = vmatprep.mubr.msk.bf16.mxu0 %vm1964_vm1, %v1963_v1  ;;  %v326_v53 = vrot.slane %v324_v45, 1  ;;  %v794_v27 = vsel %vm789_vm4, %v791_v58, %v793_v18  ;;  %v1941_v32 = vld [vmem:[%s2036_s26 + $0x20] sm:$0xff]  }
  0x27   : > { %1287 = vperm.xlu0 %1911, %v2211_v35  }
  0x28   : > { %1291 = vperm.xlu1 %1912, %v2217_v36   ;;  %v327_v60 = vsel %vm275_vm3, %v322_v41, %v326_v53  ;;  %v330_v10 = vor.u32 %v328_v61, %v326_v53  ;;  %v1943_v41 = vld [vmem:[%s2036_s26 + $0x28] sm:$0xff]   ;;  %v1966_v53 = vmov 0  }
  0x2b   : > { %1295 = vperm.xlu0 %1911, %v2225_v47  }
  0x2c   : > { %1697 = vmatmul.mubr.msk.bf16.gmra.mrb[8].mxu1 %vm372_vm2, %v303_v5  ;;  %1299 = vperm.xlu1 %1912, %v2236_v51   ;;  %v792_v5 = vsel %vm789_vm4, %v790_v57, %v791_v58  ;;  %v1945_v57 = vld [vmem:[%s2036_s26 + $0x30] sm:$0xff]  }
  0x2d   : > { %1749 = vmatmul.mubr.msk.bf16.gmra.mrb[12].mxu0 %vm372_vm2, %v1595_v0  ;;  %1700 = vmatprep.mubr.msk.bf16.mxu1 %vm1964_vm1, %v1963_v1  ;;  %v332_v0 = vshll.u32 %v1575_v55, 16 }
  0x2e   : > { %1752 = vmatprep.mubr.msk.bf16.mxu0 %vm1964_vm1, %v1963_v1 }
  0x2f   : > { %1303 = vperm.xlu0 %1911, %v2246_v56   ;;  %v334_v15 = vrot.slane %v332_v0, 1 }
  0x30   : > { %1307 = vperm.xlu1 %1912, %v2252_v59  }
  0x33   : > { %1311 = vperm.xlu0 %1911, %v2257_v2  }
  0x34   : > { %1701 = vmatmul.mubr.msk.bf16.gmra.mrb[12].mxu1 %vm372_vm2, %v311_v24  ;;  %1315 = vperm.xlu1 %1912, %v2263_v8   ;;  %v335_v24 = vsel %vm275_vm3, %v330_v10, %v334_v15 }
  0x35   : > { %1753 = vmatmul.mubr.msk.bf16.gmra.mrb[16].mxu0 %vm372_vm2, %v1596_v25  ;;  %1704 = vmatprep.mubr.msk.bf16.mxu1 %vm1964_vm1, %v1963_v1  ;;  %v336_v25 = vshrl.u32 %v1575_v55, 16 }
  0x36   : > { %1756 = vmatprep.mubr.msk.bf16.mxu0 %vm1964_vm1, %v1963_v1 }
  0x37   : > { %1319 = vperm.xlu0 %1911, %v2271_v17   ;;  %v338_v34 = vor.u32 %v336_v25, %v334_v15 }
  0x38   : > { %1323 = vperm.xlu1 %1912, %v2277_v19  }
  0x39   : > { %v343_v45 = vsel %vm275_vm3, %v338_v34, %v2109_v54  ;;  %v797_v54 = vrot.slane %v1943_v41, 1 }
  0x3b   : > { %1327 = vperm.xlu0 %1911, %v2282_v26  }
  0x3c   : > { %1705 = vmatmul.mubr.msk.bf16.gmra.mrb[16].mxu1 %vm372_vm2, %v319_v39  ;;  %v2296_v39 = vld [vmem:[%s2147_s8 + $0x90] sm:$0xff]  ;;  %1331 = vperm.xlu1 %1912, %v2288_v33  }
  0x3d   : > { %1757 = vmatmul.mubr.msk.bf16.gmra.mrb[20].mxu0 %vm372_vm2, %v1597_v40  ;;  %1708 = vmatprep.mubr.msk.bf16.mxu1 %vm1964_vm1, %v1963_v1  ;;  %v795_v40 = vrot.slane %v1941_v32, 1 }
  0x3e   : > { %1784 = vmatprep.mubr.msk.bf16.mxu0 %vm1964_vm1, %v1963_v1 }
  0x3f   : > { %1335 = vperm.xlu0 %1911, %v2296_v39   ;;  %v796_v48 = vsel %vm789_vm4, %v793_v18, %v795_v40  ;;  %v798_v55 = vsel %vm789_vm4, %v795_v40, %v797_v54 }
  0x40   : > { %1339 = vperm.xlu1 %1912, %v2302_v42  }
  0x43   : > { %1343 = vperm.xlu0 %1911, %v2308_v46  }
  0x44   : > { %1709 = vmatmul.mubr.msk.bf16.gmra.mrb[20].mxu1 %vm372_vm2, %v327_v60  ;;  %1913 = vset.pattern.permute.xlu1 %v1966_v53 }
  0x45   : > { %1785 = vmatmul.mubr.msk.bf16.vlgmr.msra.gmra.mrb[0].mxu0 %vm372_vm2, %v792_v5  ;;  %1712 = vmatprep.mubr.msk.bf16.mxu1 %vm1964_vm1, %v1963_v1 }
  0x46   : > { %1788 = vmatprep.mubr.msk.bf16.mxu0 %vm1964_vm1, %v1963_v1  ;;  %1020 = vperm.xlu1 %1913, %v2153_v12   ;;  %v799_v12 = vrot.slane %v1945_v57, 1 }
  0x47   : > { %1914 = vset.pattern.permute.xlu0 %v1966_v53 }
  0x48   : > { %1025 = vperm.xlu0 %1914, %v2168_v20   ;;  %v800_v20 = vsel %vm789_vm4, %v797_v54, %v799_v12 }
  0x4a   : > { %1030 = vperm.xlu1 %1913, %v2156_v13   ;;  %v1946_v13 = vld [vmem:[%s2036_s26 + $0x38] sm:$0xff]  }
  0x4c   : > { %1713 = vmatmul.mubr.msk.bf16.gmra.mrb[24].mxu1 %vm372_vm2, %v335_v24  ;;  %1040 = vperm.xlu0 %1914, %v2191_v28  }
  0x4d   : > { %1789 = vmatmul.mubr.msk.bf16.gmra.mrb[4].mxu0 %vm372_vm2, %v794_v27  ;;  %1716 = vmatprep.mubr.msk.bf16.mxu1 %vm1964_vm1, %v1963_v1 }
  0x4e   : > { %1792 = vmatprep.mubr.msk.bf16.mxu0 %vm1964_vm1, %v1963_v1  ;;  %1035 = vperm.xlu1 %1913, %v2184_v23   ;;  %v801_v23 = vrot.slane %v1946_v13, 1 }
  0x50   : > { %1050 = vperm.xlu0 %1914, %v2211_v35  }
  0x52   : > { %1045 = vperm.xlu1 %1913, %v2201_v31   ;;  %v802_v31 = vsel %vm789_vm4, %v799_v12, %v801_v23 }
  0x54   : > { %1717 = vmatmul.mubr.msk.bf16.gmra.mrb[28].mxu1 %vm372_vm2, %v343_v45  ;;  %1060 = vperm.xlu0 %1914, %v2225_v47  }
  0x55   : > { %1793 = vmatmul.mubr.msk.bf16.gmra.mrb[8].mxu0 %vm372_vm2, %v796_v48  ;;  %1720 = vmatprep.mubr.msk.bf16.mxu1 %vm1964_vm1, %v1963_v1 }
  0x56   : > { %1796 = vmatprep.mubr.msk.bf16.mxu0 %vm1964_vm1, %v1963_v1  ;;  %1055 = vperm.xlu1 %1913, %v2217_v36  }
  0x58   : > { %1070 = vperm.xlu0 %1914, %v2246_v56  }
  0x5a   : > { %1065 = vperm.xlu1 %1913, %v2236_v51  }
  0x5c   : > { %1721 = vmatmul.mubr.msk.bf16.gmra.mrb[32].mxu1 %vm372_vm2, %v2136_v4  ;;  %v360_v4 = vshrl.u32 %v2104_v52, 16  ;;  %1080 = vperm.xlu0 %1914, %v2257_v2  }
  0x5d   : > { %1797 = vmatmul.mubr.msk.bf16.gmra.mrb[12].mxu0 %vm372_vm2, %v798_v55  ;;  %1724 = vmatprep.mubr.msk.bf16.mxu1 %vm1964_vm1, %v1963_v1 }
  0x5e   : > { %1800 = vmatprep.mubr.msk.bf16.mxu0 %vm1964_vm1, %v1963_v1  ;;  %v362_v28 = vor.u32 %v360_v4, %v2120_v62  ;;  %1075 = vperm.xlu1 %1913, %v2252_v59   ;;  %v1598_v62 = vcombine.low %v2133_v3, %v2194_v29  ;;  %v1599_v3 = vcombine.low %v2197_v30, %v2229_v49 }
  0x60   : > { %1090 = vperm.xlu0 %1914, %v2271_v17  }
  0x62   : > { %1085 = vperm.xlu1 %1913, %v2263_v8  }
  0x64   : > { %1725 = vmatmul.mubr.msk.bf16.gmra.mrb[36].mxu1 %vm372_vm2, %v2141_v9  ;;  %v1947_v9 = vld [vmem:[%s2036_s26 + $0x40] sm:$0xff]   ;;  %1100 = vperm.xlu0 %1914, %v2282_v26  }
  0x65   : > { %1801 = vmatmul.mubr.msk.bf16.gmra.mrb[16].mxu0 %vm372_vm2, %v800_v20  ;;  %1728 = vmatprep.mubr.msk.bf16.mxu1 %vm1964_vm1, %v1963_v1  ;;  %v803_v52 = vrot.slane %v1947_v9, 1 }
  0x66   : > { %1804 = vmatprep.mubr.msk.bf16.mxu0 %vm1964_vm1, %v1963_v1  ;;  %1095 = vperm.xlu1 %1913, %v2277_v19  }
  0x67   : > { %v804_v35 = vsel %vm789_vm4, %v801_v23, %v803_v52  ;;  %v806_v29 = vsel %vm789_vm4, %v803_v52, %v805_v14  ;;  %v1601_v14 = vcombine.low %v2081_v38, %v2094_v43 }
  0x68   : > { %1110 = vperm.xlu0 %1914, %v2296_v39  }
  0x6a   : > { %1105 = vperm.xlu1 %1913, %v2288_v33  }
  0x6c   : > { %1729 = vmatmul.mubr.msk.bf16.gmra.mrb[40].mxu1 %vm372_vm2, %v362_v28  ;;  %1120 = vperm.xlu0 %1914, %v2308_v46  }
  0x6d   : > { %1805 = vmatmul.mubr.msk.bf16.gmra.mrb[20].mxu0 %vm372_vm2, %v802_v31  ;;  %1760 = vmatprep.mubr.msk.bf16.mxu1 %vm1964_vm1, %v1963_v1 }
  0x6e   : > { %1808 = vmatprep.mubr.msk.bf16.mxu0 %vm1964_vm1, %v1963_v1  ;;  %1115 = vperm.xlu1 %1913, %v2302_v42  }
  0x70   : > { %1915 = vset.pattern.permute.xlu0 %v1965_v7  ;;  %v1602_v7 = vcombine.low %v2097_v44, %v2097_v44 }
  0x74   : > { %1761 = vmatmul.mubr.msk.bf16.vlgmr.msra.gmra.mrb[24].mxu1 %vm372_vm2, %v1598_v62 }
  0x75   : > { %1809 = vmatmul.mubr.msk.bf16.gmra.mrb[24].mxu0 %vm372_vm2, %v804_v35  ;;  %1764 = vmatprep.mubr.msk.bf16.mxu1 %vm1964_vm1, %v1963_v1 }
  0x76   : > { %1812 = vmatprep.mubr.msk.bf16.mxu0 %vm1964_vm1, %v1963_v1 }
  0x7c   : > { %1765 = vmatmul.mubr.msk.bf16.gmra.mrb[28].mxu1 %vm372_vm2, %v1599_v3 }
  0x7d   : > { %1813 = vmatmul.mubr.msk.bf16.gmra.mrb[28].mxu0 %vm372_vm2, %v806_v29  ;;  %1768 = vmatprep.mubr.msk.bf16.mxu1 %vm1964_vm1, %v1963_v1 }
  0x7e   : > { %1816 = vmatprep.mubr.msk.bf16.mxu0 %vm1964_vm1, %v1963_v1 }
  0x84   : > { %1769 = vmatmul.mubr.msk.bf16.gmra.mrb[32].mxu1 %vm372_vm2, %v1600_v63 }
  0x85   : > { %1817 = vmatmul.mubr.msk.bf16.gmra.mrb[32].mxu0 %vm372_vm2, %v2173_v21  ;;  %1772 = vmatprep.mubr.msk.bf16.mxu1 %vm1964_vm1, %v1963_v1 }
  0x86   : > { %1820 = vmatprep.mubr.msk.bf16.mxu0 %vm1964_vm1, %v1963_v1 }
  0x8c   : > { %1773 = vmatmul.mubr.msk.bf16.gmra.mrb[36].mxu1 %vm372_vm2, %v1601_v14 }
  0x8d   : > { %1821 = vmatmul.mubr.msk.bf16.gmra.mrb[36].mxu0 %vm372_vm2, %v2181_v22  ;;  %1776 = vmatprep.mubr.msk.bf16.mxu1 %vm1964_vm1, %v1963_v1 }
  0x8e   : > { %1824 = vmatprep.mubr.msk.bf16.mxu0 %vm1964_vm1, %v1963_v1 }
  0x94   : > { %1777 = vmatmul.mubr.msk.bf16.gmra.mrb[40].mxu1 %vm372_vm2, %v1602_v7 }
  0x95   : > { %1825 = vmatmul.mubr.msk.bf16.gmra.mrb[40].mxu0 %vm372_vm2, %v809_v16 }
  0x9a   : > { %v1264_v37 = vpop.permute.xlu0 %1263 }
  0x9b   : > { %v2414_v38 = vpop.permute.xlu1 %1271 }
  0x9e   : > { %v1268_v43 = vpop.permute.xlu0 %1267 }
  0x9f   : > { %v2416_v21 = vpop.permute.xlu1 %1275 }
  0xa2   : > { %v2418_v22 = vpop.permute.xlu0 %1279 }
  0xa3   : > { %v2420_v30 = vpop.permute.xlu1 %1283 }
  0xa6   : > { %v2422_v1 = vpop.permute.xlu0 %1287 }
  0xa7   : > { %v2424_v36 = vpop.permute.xlu1 %1291 }
  0xaa   : > { %v2426_v11 = vpop.permute.xlu0 %1295 }
  0xab   : > { %v2428_v50 = vpop.permute.xlu1 %1299 }
  0xae   : > { %v2430_v56 = vpop.permute.xlu0 %1303 }
  0xaf   : > { %v2434_v60 = vpop.permute.xlu1 %1307 }
  0xb2   : > { %v2436_v0 = vpop.permute.xlu0 %1311 }
  0xb3   : > { %v2440_v5 = vpop.permute.xlu1 %1315 }
  0xb6   : > { %v2444_v15 = vpop.permute.xlu0 %1319 }
  0xb7   : > { %v2446_v17 = vpop.permute.xlu1 %1323 }
  0xba   : > { %v2452_v25 = vpop.permute.xlu0 %1327 }
  0xbb   : > { %v2454_v27 = vpop.permute.xlu1 %1331 }
  0xbe   : > { %v2458_v33 = vpop.permute.xlu0 %1335 }
  0xbf   : > { %v2462_v40 = vpop.permute.xlu1 %1339 }
  0xc2   : > { %v2464_v45 = vpop.permute.xlu0 %1343 }
  0xc5   : > { %v1021_v48 = vpop.permute.xlu1 %1020 }
  0xc7   : > { %v1026_v31 = vpop.permute.xlu0 %1025 }
  0xc9   : > { %v1031_v62 = vpop.permute.xlu1 %1030 }
  0xef   : > { %v444_v44 = vpop.f32.mrb[0].mxu1 }
  0xf0   : > { %v1690_v47 = vpop.f32.mrb[1].mxu1 }
  0xf1   : > { %v447_v49 = vpop.f32.mrb[2].mxu1 }
  0xf2   : > { %v1691_v16 = vpop.f32.mrb[3].mxu1 }
  0xf7   : > { %v452_v51 = vpop.f32.mrb[4].mxu1 }
  0xf8   : > { %v1694_v58 = vpop.f32.mrb[5].mxu1 }
  0xf9   : > { %v2432_v59 = vpop.f32.mrb[6].mxu1 }
  0xfa   : > { %v1695_v61 = vpop.f32.mrb[7].mxu1 }
  0xff   : > { %v2438_v2 = vpop.f32.mrb[8].mxu1 }
 0x100   : > { %v1698_v6 = vpop.f32.mrb[9].mxu1 }
 0x101   : > { %v2442_v8 = vpop.f32.mrb[10].mxu1 }
 0x102   : > { %v1699_v10 = vpop.f32.mrb[11].mxu1 }
 0x107   : > { %v2448_v18 = vpop.f32.mrb[12].mxu1 }
 0x108   : > { %v1702_v19 = vpop.f32.mrb[13].mxu1 }
 0x109   : > { %v2450_v24 = vpop.f32.mrb[14].mxu1 }
 0x10a   : > { %v1703_v26 = vpop.f32.mrb[15].mxu1 }
 0x10f   : > { %v2456_v32 = vpop.f32.mrb[16].mxu1 }
 0x110   : > { %v1706_v34 = vpop.f32.mrb[17].mxu1 }
 0x111   : > { %v2460_v39 = vpop.f32.mrb[18].mxu1 }
 0x112   : > { %v1707_v42 = vpop.f32.mrb[19].mxu1 }
 0x117   : > { %v2466_v46 = vpop.f32.mrb[20].mxu1 }
 0x118   : > { %v1710_v41 = vpop.f32.mrb[21].mxu1  ;;  %v890_v54 = vpop.f32.mrb[0].mxu0 }
 0x119   : > { %v1832_v53 = vadd.f32 %v890_v54, %v444_v44  ;;  %v2468_v55 = vpop.f32.mrb[22].mxu1  ;;  %v1786_v57 = vpop.f32.mrb[1].mxu0 }
 0x11a   : > { %v1711_v12 = vpop.f32.mrb[23].mxu1  ;;  %v893_v20 = vpop.f32.mrb[2].mxu0 }
 0x11b   : > { %v1346_v13 = vmul.f32 %v1832_v53, %v1264_v37  ;;  %v1833_v4 = vadd.f32 %v893_v20, %v447_v49  ;;  %v1123_v23 = vmul.f32 %v1832_v53, %v1021_v48  ;;  %v1787_v28 = vpop.f32.mrb[3].mxu0  ;;  %v1036_v57 = vpop.permute.xlu1 %1035 }
 0x11d   : > { %v1420_v9 = vmul.f32 %v1832_v53, %v1346_v13  ;;  %v1347_v52 = vmul.f32 %v1833_v4, %v1268_v43  ;;  %v1193_v35 = vmul.f32 %v1832_v53, %v1123_v23  ;;  %v1124_v3 = vmul.f32 %v1833_v4, %v1026_v31 }
 0x11e   : > { %v1368_v29 = vsel %vm1367_vm5, %v1346_v13, 0.0  ;;  %v1145_v44 = vsel %vm1144_vm6, %v1123_v23, 0.0 }
 0x11f   : > { %v1369_v63 = vsel %vm1367_vm5, %v1347_v52, 0.0  ;;  %v1421_v14 = vmul.f32 %v1833_v4, %v1347_v52  ;;  %v1146_v37 = vsel %vm1144_vm6, %v1124_v3, 0.0  ;;  %v1194_v47 = vmul.f32 %v1833_v4, %v1124_v3 }
 0x120   : > { %v1370_v7 = vadd.f32 %v1369_v63, %v1368_v29  ;;  %v898_v49 = vpop.f32.mrb[4].mxu0  ;;  %v1441_v16 = vsel %vm1367_vm5, %v1420_v9, 0.0  ;;  %v1147_v58 = vadd.f32 %v1146_v37, %v1145_v44  ;;  %v1214_v19 = vsel %vm1144_vm6, %v1193_v35, 0.0  ;;  %v1041_v37 = vpop.permute.xlu0 %1040 }
 0x121   : > { %v1442_v43 = vsel %vm1367_vm5, %v1421_v14, 0.0  ;;  %v1834_v61 = vadd.f32 %v898_v49, %v452_v51  ;;  %v1790_v6 = vpop.f32.mrb[5].mxu0  ;;  %v1215_v26 = vsel %vm1144_vm6, %v1194_v47, 0.0 }
 0x122   : > { %v1443_v10 = vadd.f32 %v1442_v43, %v1441_v16  ;;  %v901_v34 = vpop.f32.mrb[6].mxu0  ;;  %v1216_v42 = vadd.f32 %v1215_v26, %v1214_v19  ;;  %v1046_v16 = vpop.permute.xlu1 %1045 }
 0x123   : > { %v1348_v48 = vmul.f32 %v1834_v61, %v2414_v38  ;;  %v1125_v41 = vmul.f32 %v1834_v61, %v1031_v62  ;;  %v1835_v54 = vadd.f32 %v901_v34, %v2432_v59  ;;  %v1791_v53 = vpop.f32.mrb[7].mxu0 }
 0x125   : > { %v1371_v12 = vsel %vm1367_vm5, %v1348_v48, 0.0  ;;  %v1422_v20 = vmul.f32 %v1834_v61, %v1348_v48  ;;  %v1148_v51 = vsel %vm1144_vm6, %v1125_v41, 0.0  ;;  %v1195_v13 = vmul.f32 %v1834_v61, %v1125_v41 }
 0x126   : > { %v1372_v4 = vadd.f32 %v1371_v12, %v1370_v7  ;;  %v1149_v23 = vadd.f32 %v1148_v51, %v1147_v58  ;;  %v1349_v28 = vmul.f32 %v1835_v54, %v2416_v21  ;;  %v1126_v31 = vmul.f32 %v1835_v54, %v1036_v57 }
 0x127   : > { %v1444_v9 = vsel %vm1367_vm5, %v1422_v20, 0.0  ;;  %v1217_v38 = vsel %vm1144_vm6, %v1195_v13, 0.0 }
 0x128   : > { %v1445_v52 = vadd.f32 %v1444_v9, %v1443_v10  ;;  %v1218_v62 = vadd.f32 %v1217_v38, %v1216_v42  ;;  %v1373_v59 = vsel %vm1367_vm5, %v1349_v28, 0.0  ;;  %v1423_v35 = vmul.f32 %v1835_v54, %v1349_v28  ;;  %v906_v3 = vpop.f32.mrb[8].mxu0 }
 0x129   : > { %v1374_v29 = vadd.f32 %v1373_v59, %v1372_v4  ;;  %v1150_v63 = vsel %vm1144_vm6, %v1126_v31, 0.0  ;;  %v1196_v14 = vmul.f32 %v1835_v54, %v1126_v31  ;;  %v1836_v7 = vadd.f32 %v906_v3, %v2438_v2  ;;  %v1794_v44 = vpop.f32.mrb[9].mxu0  ;;  %v1056_v3 = vpop.permute.xlu1 %1055 }
 0x12a   : > { %v1446_v21 = vsel %vm1367_vm5, %v1423_v35, 0.0  ;;  %v1151_v47 = vadd.f32 %v1150_v63, %v1149_v23  ;;  %v909_v49 = vpop.f32.mrb[10].mxu0 }
 0x12b   : > { %v1447_v43 = vadd.f32 %v1446_v21, %v1445_v52  ;;  %v1219_v58 = vsel %vm1144_vm6, %v1196_v14, 0.0  ;;  %v1350_v61 = vmul.f32 %v1836_v7, %v2418_v22  ;;  %v1837_v6 = vadd.f32 %v909_v49, %v2442_v8  ;;  %v1795_v10 = vpop.f32.mrb[11].mxu0  ;;  %v1051_v52 = vpop.permute.xlu0 %1050 }
 0x12c   : > { %v1220_v19 = vadd.f32 %v1219_v58, %v1218_v62  ;;  %v1127_v26 = vmul.f32 %v1836_v7, %v1041_v37 }
 0x12d   : > { %v1375_v34 = vsel %vm1367_vm5, %v1350_v61, 0.0  ;;  %v1424_v2 = vmul.f32 %v1836_v7, %v1350_v61  ;;  %v1351_v42 = vmul.f32 %v1837_v6, %v2420_v30  ;;  %v1128_v48 = vmul.f32 %v1837_v6, %v1046_v16 }
 0x12e   : > { %v1376_v41 = vadd.f32 %v1375_v34, %v1374_v29  ;;  %v1152_v54 = vsel %vm1144_vm6, %v1127_v26, 0.0  ;;  %v1197_v53 = vmul.f32 %v1836_v7, %v1127_v26 }
 0x12f   : > { %v1448_v57 = vsel %vm1367_vm5, %v1424_v2, 0.0  ;;  %v1377_v12 = vsel %vm1367_vm5, %v1351_v42, 0.0  ;;  %v1425_v22 = vmul.f32 %v1837_v6, %v1351_v42  ;;  %v1153_v20 = vadd.f32 %v1152_v54, %v1151_v47  ;;  %v1061_v54 = vpop.permute.xlu0 %1060 }
 0x130   : > { %v1449_v8 = vadd.f32 %v1448_v57, %v1447_v43  ;;  %v1378_v51 = vadd.f32 %v1377_v12, %v1376_v41  ;;  %v1221_v13 = vsel %vm1144_vm6, %v1197_v53, 0.0  ;;  %v1154_v4 = vsel %vm1144_vm6, %v1128_v48, 0.0  ;;  %v914_v23 = vpop.f32.mrb[12].mxu0 }
 0x131   : > { %v1450_v30 = vsel %vm1367_vm5, %v1425_v22, 0.0  ;;  %v1222_v28 = vadd.f32 %v1221_v13, %v1220_v19  ;;  %v1155_v31 = vadd.f32 %v1154_v4, %v1153_v20  ;;  %v1198_v9 = vmul.f32 %v1837_v6, %v1128_v48  ;;  %v1798_v38 = vpop.f32.mrb[13].mxu0  ;;  %v1066_v20 = vpop.permute.xlu1 %1065 }
 0x132   : > { %v1451_v62 = vadd.f32 %v1450_v30, %v1449_v8  ;;  %v1838_v59 = vadd.f32 %v914_v23, %v2448_v18  ;;  %v917_v35 = vpop.f32.mrb[14].mxu0 }
 0x133   : > { %v1223_v29 = vsel %vm1144_vm6, %v1198_v9, 0.0  ;;  %v1839_v63 = vadd.f32 %v917_v35, %v2450_v24  ;;  %v1799_v14 = vpop.f32.mrb[15].mxu0 }
 0x134   : > { %v1224_v7 = vadd.f32 %v1223_v29, %v1222_v28  ;;  %v1352_v44 = vmul.f32 %v1838_v59, %v2422_v1  ;;  %v1129_v37 = vmul.f32 %v1838_v59, %v1051_v52 }
 0x135   : > { %v1353_v21 = vmul.f32 %v1839_v63, %v2424_v36  ;;  %v1130_v47 = vmul.f32 %v1839_v63, %v1056_v3 }
 0x136   : > { %v1379_v49 = vsel %vm1367_vm5, %v1352_v44, 0.0  ;;  %v1426_v16 = vmul.f32 %v1838_v59, %v1352_v44  ;;  %v1156_v43 = vsel %vm1144_vm6, %v1129_v37, 0.0  ;;  %v1199_v18 = vmul.f32 %v1838_v59, %v1129_v37 }
 0x137   : > { %v1380_v58 = vadd.f32 %v1379_v49, %v1378_v51  ;;  %v1381_v61 = vsel %vm1367_vm5, %v1353_v21, 0.0  ;;  %v1427_v6 = vmul.f32 %v1839_v63, %v1353_v21  ;;  %v1157_v10 = vadd.f32 %v1156_v43, %v1155_v31 }
 0x138   : > { %v1452_v24 = vsel %vm1367_vm5, %v1426_v16, 0.0  ;;  %v1225_v19 = vsel %vm1144_vm6, %v1199_v18, 0.0  ;;  %v1158_v1 = vsel %vm1144_vm6, %v1130_v47, 0.0  ;;  %v1200_v26 = vmul.f32 %v1839_v63, %v1130_v47  ;;  %v922_v36 = vpop.f32.mrb[16].mxu0  ;;  %v1071_v47 = vpop.permute.xlu0 %1070 }
 0x139   : > { %v1453_v34 = vadd.f32 %v1452_v24, %v1451_v62  ;;  %v1382_v2 = vadd.f32 %v1381_v61, %v1380_v58  ;;  %v1454_v42 = vsel %vm1367_vm5, %v1427_v6, 0.0  ;;  %v1226_v48 = vadd.f32 %v1225_v19, %v1224_v7  ;;  %v1802_v41 = vpop.f32.mrb[17].mxu0  ;;  %v1076_v58 = vpop.permute.xlu1 %1075 }
 0x13a   : > { %v1159_v53 = vadd.f32 %v1158_v1, %v1157_v10  ;;  %v1227_v57 = vsel %vm1144_vm6, %v1200_v26, 0.0  ;;  %v1840_v12 = vadd.f32 %v922_v36, %v2456_v32  ;;  %v925_v22 = vpop.f32.mrb[18].mxu0 }
 0x13b   : > { %v1455_v8 = vadd.f32 %v1454_v42, %v1453_v34  ;;  %v1228_v51 = vadd.f32 %v1227_v57, %v1226_v48  ;;  %v1841_v13 = vadd.f32 %v925_v22, %v2460_v39  ;;  %v1803_v4 = vpop.f32.mrb[19].mxu0 }
 0x13c   : > { %v1354_v23 = vmul.f32 %v1840_v12, %v2426_v11  ;;  %v1131_v30 = vmul.f32 %v1840_v12, %v1061_v54 }
 0x13d   : > { %v1355_v28 = vmul.f32 %v1841_v13, %v2428_v50  ;;  %v1132_v31 = vmul.f32 %v1841_v13, %v1066_v20 }
 0x13e   : > { %v1383_v9 = vsel %vm1367_vm5, %v1354_v23, 0.0  ;;  %v1428_v38 = vmul.f32 %v1840_v12, %v1354_v23  ;;  %v1160_v52 = vsel %vm1144_vm6, %v1131_v30, 0.0  ;;  %v1201_v62 = vmul.f32 %v1840_v12, %v1131_v30  ;;  %v1086_v12 = vpop.permute.xlu1 %1085 }
 0x13f   : > { %v1384_v32 = vadd.f32 %v1383_v9, %v1382_v2  ;;  %v1385_v59 = vsel %vm1367_vm5, %v1355_v28, 0.0  ;;  %v1429_v35 = vmul.f32 %v1841_v13, %v1355_v28  ;;  %v1161_v3 = vadd.f32 %v1160_v52, %v1159_v53 }
 0x140   : > { %v1456_v39 = vsel %vm1367_vm5, %v1428_v38, 0.0  ;;  %v1229_v29 = vsel %vm1144_vm6, %v1201_v62, 0.0  ;;  %v1162_v11 = vsel %vm1144_vm6, %v1132_v31, 0.0  ;;  %v1202_v63 = vmul.f32 %v1841_v13, %v1132_v31  ;;  %v930_v50 = vpop.f32.mrb[20].mxu0 }
 0x141   : > { %v1457_v14 = vadd.f32 %v1456_v39, %v1455_v8  ;;  %v1386_v7 = vadd.f32 %v1385_v59, %v1384_v32  ;;  %v1458_v44 = vsel %vm1367_vm5, %v1429_v35, 0.0  ;;  %v1230_v37 = vadd.f32 %v1229_v29, %v1228_v51  ;;  %v1806_v21 = vpop.f32.mrb[21].mxu0 }
 0x142   : > { %v1163_v49 = vadd.f32 %v1162_v11, %v1161_v3  ;;  %v1231_v16 = vsel %vm1144_vm6, %v1202_v63, 0.0  ;;  %v1842_v43 = vadd.f32 %v930_v50, %v2466_v46  ;;  %v933_v18 = vpop.f32.mrb[22].mxu0  ;;  %v1081_v46 = vpop.permute.xlu0 %1080 }
 0x143   : > { %v1459_v61 = vadd.f32 %v1458_v44, %v1457_v14  ;;  %v1232_v6 = vadd.f32 %v1231_v16, %v1230_v37  ;;  %v1843_v10 = vadd.f32 %v933_v18, %v2468_v55  ;;  %v1807_v24 = vpop.f32.mrb[23].mxu0 }
 0x144   : > { %v1356_v19 = vmul.f32 %v1842_v43, %v2430_v56  ;;  %v1133_v1 = vmul.f32 %v1842_v43, %v1071_v47 }
 0x145   : > { %v1357_v26 = vmul.f32 %v1843_v10, %v2434_v60  ;;  %v1134_v36 = vmul.f32 %v1843_v10, %v1076_v58  ;;  %v1096_v58 = vpop.permute.xlu1 %1095 }
 0x146   : > { %v1387_v34 = vsel %vm1367_vm5, %v1356_v19, 0.0  ;;  %v1430_v2 = vmul.f32 %v1842_v43, %v1356_v19  ;;  %v1164_v42 = vsel %vm1144_vm6, %v1133_v1, 0.0  ;;  %v1203_v48 = vmul.f32 %v1842_v43, %v1133_v1  ;;  %v1091_v21 = vpop.permute.xlu0 %1090 }
 0x147   : > { %v1388_v41 = vadd.f32 %v1387_v34, %v1386_v7  ;;  %v1389_v54 = vsel %vm1367_vm5, %v1357_v26, 0.0  ;;  %v1431_v53 = vmul.f32 %v1843_v10, %v1357_v26  ;;  %v1165_v57 = vadd.f32 %v1164_v42, %v1163_v49  ;;  %v670_v55 = vpop.f32.mrb[24].mxu1 }
 0x148   : > { %v1460_v56 = vsel %vm1367_vm5, %v1430_v2, 0.0  ;;  %v1233_v22 = vsel %vm1144_vm6, %v1203_v48, 0.0  ;;  %v1166_v60 = vsel %vm1144_vm6, %v1134_v36, 0.0  ;;  %v1204_v20 = vmul.f32 %v1843_v10, %v1134_v36  ;;  %v1762_v8 = vpop.f32.mrb[25].mxu1  ;;  %v938_v51 = vpop.f32.mrb[24].mxu0 }
 0x149   : > { %v1461_v13 = vadd.f32 %v1460_v56, %v1459_v61  ;;  %v1390_v4 = vadd.f32 %v1389_v54, %v1388_v41  ;;  %v1462_v23 = vsel %vm1367_vm5, %v1431_v53, 0.0  ;;  %v1234_v30 = vadd.f32 %v1233_v22, %v1232_v6  ;;  %v673_v28 = vpop.f32.mrb[26].mxu1  ;;  %v1810_v31 = vpop.f32.mrb[25].mxu0 }
 0x14a   : > { %v1167_v9 = vadd.f32 %v1166_v60, %v1165_v57  ;;  %v1235_v38 = vsel %vm1144_vm6, %v1204_v20, 0.0  ;;  %v1844_v52 = vadd.f32 %v938_v51, %v670_v55  ;;  %v1763_v62 = vpop.f32.mrb[27].mxu1  ;;  %v941_v32 = vpop.f32.mrb[26].mxu0 }
 0x14b   : > { %v1463_v59 = vadd.f32 %v1462_v23, %v1461_v13  ;;  %v1236_v35 = vadd.f32 %v1235_v38, %v1234_v30  ;;  %v1845_v3 = vadd.f32 %v941_v32, %v673_v28  ;;  %v1811_v39 = vpop.f32.mrb[27].mxu0  ;;  %v1101_v23 = vpop.permute.xlu0 %1100 }
 0x14c   : > { %v1358_v29 = vmul.f32 %v1844_v52, %v2436_v0  ;;  %v1135_v11 = vmul.f32 %v1844_v52, %v1081_v46 }
 0x14d   : > { %v1359_v63 = vmul.f32 %v1845_v3, %v2440_v5  ;;  %v1136_v50 = vmul.f32 %v1845_v3, %v1086_v12 }
 0x14e   : > { %v1391_v14 = vsel %vm1367_vm5, %v1358_v29, 0.0  ;;  %v1432_v7 = vmul.f32 %v1844_v52, %v1358_v29  ;;  %v1168_v44 = vsel %vm1144_vm6, %v1135_v11, 0.0  ;;  %v1205_v37 = vmul.f32 %v1844_v52, %v1135_v11  ;;  %v1106_v52 = vpop.permute.xlu1 %1105 }
 0x14f   : > { %v1392_v47 = vadd.f32 %v1391_v14, %v1390_v4  ;;  %v1393_v49 = vsel %vm1367_vm5, %v1359_v63, 0.0  ;;  %v1433_v16 = vmul.f32 %v1845_v3, %v1359_v63  ;;  %v1169_v43 = vadd.f32 %v1168_v44, %v1167_v9  ;;  %v678_v18 = vpop.f32.mrb[28].mxu1 }
 0x150   : > { %v1464_v0 = vsel %vm1367_vm5, %v1432_v7, 0.0  ;;  %v1237_v61 = vsel %vm1144_vm6, %v1205_v37, 0.0  ;;  %v1170_v5 = vsel %vm1144_vm6, %v1136_v50, 0.0  ;;  %v1206_v6 = vmul.f32 %v1845_v3, %v1136_v50  ;;  %v1766_v10 = vpop.f32.mrb[29].mxu1  ;;  %v946_v24 = vpop.f32.mrb[28].mxu0 }
 0x151   : > { %v1465_v19 = vadd.f32 %v1464_v0, %v1463_v59  ;;  %v1394_v1 = vadd.f32 %v1393_v49, %v1392_v47  ;;  %v1466_v26 = vsel %vm1367_vm5, %v1433_v16, 0.0  ;;  %v1238_v36 = vadd.f32 %v1237_v61, %v1236_v35  ;;  %v681_v34 = vpop.f32.mrb[30].mxu1  ;;  %v1814_v2 = vpop.f32.mrb[29].mxu0 }
 0x152   : > { %v1171_v42 = vadd.f32 %v1170_v5, %v1169_v43  ;;  %v1239_v48 = vsel %vm1144_vm6, %v1206_v6, 0.0  ;;  %v1846_v46 = vadd.f32 %v946_v24, %v678_v18  ;;  %v1767_v41 = vpop.f32.mrb[31].mxu1  ;;  %v949_v54 = vpop.f32.mrb[30].mxu0 }
 0x153   : > { %v1467_v53 = vadd.f32 %v1466_v26, %v1465_v19  ;;  %v1240_v57 = vadd.f32 %v1239_v48, %v1238_v36  ;;  %v1847_v55 = vadd.f32 %v949_v54, %v681_v34  ;;  %v1815_v12 = vpop.f32.mrb[31].mxu0  ;;  %v1111_v19 = vpop.permute.xlu0 %1110 }
 0x154   : > { %v1360_v56 = vmul.f32 %v1846_v46, %v2444_v15  ;;  %v1137_v22 = vmul.f32 %v1846_v46, %v1091_v21 }
 0x155   : > { %v1361_v60 = vmul.f32 %v1847_v55, %v2446_v17  ;;  %v1138_v20 = vmul.f32 %v1847_v55, %v1096_v58 }
 0x156   : > { %v1395_v8 = vsel %vm1367_vm5, %v1360_v56, 0.0  ;;  %v1434_v51 = vmul.f32 %v1846_v46, %v1360_v56  ;;  %v1172_v13 = vsel %vm1144_vm6, %v1137_v22, 0.0  ;;  %v1207_v4 = vmul.f32 %v1846_v46, %v1137_v22 }
 0x157   : > { %v1396_v30 = vadd.f32 %v1395_v8, %v1394_v1  ;;  %v1397_v28 = vsel %vm1367_vm5, %v1361_v60, 0.0  ;;  %v1435_v31 = vmul.f32 %v1847_v55, %v1361_v60  ;;  %v1173_v9 = vadd.f32 %v1172_v13, %v1171_v42  ;;  %v686_v38 = vpop.f32.mrb[32].mxu1  ;;  %v1116_v42 = vpop.permute.xlu1 %1115 }
 0x158   : > { %v1468_v15 = vsel %vm1367_vm5, %v1434_v51, 0.0  ;;  %v1241_v62 = vsel %vm1144_vm6, %v1207_v4, 0.0  ;;  %v1174_v17 = vsel %vm1144_vm6, %v1138_v20, 0.0  ;;  %v1208_v32 = vmul.f32 %v1847_v55, %v1138_v20  ;;  %v1770_v59 = vpop.f32.mrb[33].mxu1  ;;  %v954_v35 = vpop.f32.mrb[32].mxu0 }
 0x159   : > { %v1469_v3 = vadd.f32 %v1468_v15, %v1467_v53  ;;  %v1398_v39 = vadd.f32 %v1397_v28, %v1396_v30  ;;  %v1470_v29 = vsel %vm1367_vm5, %v1435_v31, 0.0  ;;  %v1242_v11 = vadd.f32 %v1241_v62, %v1240_v57  ;;  %v689_v63 = vpop.f32.mrb[34].mxu1  ;;  %v1818_v50 = vpop.f32.mrb[33].mxu0 }
 0x15a   : > { %v1175_v14 = vadd.f32 %v1174_v17, %v1173_v9  ;;  %v1243_v7 = vsel %vm1144_vm6, %v1208_v32, 0.0  ;;  %v1848_v44 = vadd.f32 %v954_v35, %v686_v38  ;;  %v1771_v37 = vpop.f32.mrb[35].mxu1  ;;  %v957_v21 = vpop.f32.mrb[34].mxu0 }
 0x15b   : > { %v1471_v47 = vadd.f32 %v1470_v29, %v1469_v3  ;;  %v1244_v49 = vadd.f32 %v1243_v7, %v1242_v11  ;;  %v1849_v16 = vadd.f32 %v957_v21, %v689_v63  ;;  %v1819_v43 = vpop.f32.mrb[35].mxu0  ;;  %v1121_v11 = vpop.permute.xlu0 %1120 }
 0x15c   : > { %v1362_v18 = vmul.f32 %v1848_v44, %v2452_v25  ;;  %v1139_v58 = vmul.f32 %v1848_v44, %v1101_v23 }
 0x15d   : > { %v1363_v0 = vmul.f32 %v1849_v16, %v2454_v27  ;;  %v1140_v61 = vmul.f32 %v1849_v16, %v1106_v52 }
 0x15e   : > { %v1399_v5 = vsel %vm1367_vm5, %v1362_v18, 0.0  ;;  %v1436_v6 = vmul.f32 %v1848_v44, %v1362_v18  ;;  %v1176_v10 = vsel %vm1144_vm6, %v1139_v58, 0.0  ;;  %v1209_v24 = vmul.f32 %v1848_v44, %v1139_v58 }
 0x15f   : > { %v1400_v1 = vadd.f32 %v1399_v5, %v1398_v39  ;;  %v1401_v26 = vsel %vm1367_vm5, %v1363_v0, 0.0  ;;  %v1437_v36 = vmul.f32 %v1849_v16, %v1363_v0  ;;  %v1177_v34 = vadd.f32 %v1176_v10, %v1175_v14  ;;  %v694_v2 = vpop.f32.mrb[36].mxu1 }
 0x160   : > { %v1472_v25 = vsel %vm1367_vm5, %v1436_v6, 0.0  ;;  %v1245_v48 = vsel %vm1144_vm6, %v1209_v24, 0.0  ;;  %v1178_v27 = vsel %vm1144_vm6, %v1140_v61, 0.0  ;;  %v1210_v46 = vmul.f32 %v1849_v16, %v1140_v61  ;;  %v1774_v41 = vpop.f32.mrb[37].mxu1  ;;  %v962_v54 = vpop.f32.mrb[36].mxu0 }
 0x161   : > { %v1473_v53 = vadd.f32 %v1472_v25, %v1471_v47  ;;  %v1402_v57 = vadd.f32 %v1401_v26, %v1400_v1  ;;  %v1474_v55 = vsel %vm1367_vm5, %v1437_v36, 0.0  ;;  %v1246_v12 = vadd.f32 %v1245_v48, %v1244_v49  ;;  %v697_v56 = vpop.f32.mrb[38].mxu1  ;;  %v1822_v22 = vpop.f32.mrb[37].mxu0 }
 0x162   : > { %v1179_v60 = vadd.f32 %v1178_v27, %v1177_v34  ;;  %v1247_v20 = vsel %vm1144_vm6, %v1210_v46, 0.0  ;;  %v1850_v8 = vadd.f32 %v962_v54, %v694_v2  ;;  %v1775_v51 = vpop.f32.mrb[39].mxu1  ;;  %v965_v13 = vpop.f32.mrb[38].mxu0 }
 0x163   : > { %v1475_v4 = vadd.f32 %v1474_v55, %v1473_v53  ;;  %v1248_v23 = vadd.f32 %v1247_v20, %v1246_v12  ;;  %v1851_v30 = vadd.f32 %v965_v13, %v697_v56  ;;  %v1823_v28 = vpop.f32.mrb[39].mxu0 }
 0x164   : > { %v1364_v31 = vmul.f32 %v1850_v8, %v2458_v33  ;;  %v1141_v9 = vmul.f32 %v1850_v8, %v1111_v19 }
 0x165   : > { %v1365_v38 = vmul.f32 %v1851_v30, %v2462_v40  ;;  %v1142_v52 = vmul.f32 %v1851_v30, %v1116_v42 }
 0x166   : > { %v1403_v15 = vsel %vm1367_vm5, %v1364_v31, 0.0  ;;  %v1438_v62 = vmul.f32 %v1850_v8, %v1364_v31  ;;  %v1180_v17 = vsel %vm1144_vm6, %v1141_v9, 0.0  ;;  %v1211_v32 = vmul.f32 %v1850_v8, %v1141_v9 }
 0x167   : > { %v1404_v59 = vadd.f32 %v1403_v15, %v1402_v57  ;;  %v1405_v35 = vsel %vm1367_vm5, %v1365_v38, 0.0  ;;  %v1439_v3 = vmul.f32 %v1851_v30, %v1365_v38  ;;  %v1181_v39 = vadd.f32 %v1180_v17, %v1179_v60  ;;  %v702_v29 = vpop.f32.mrb[40].mxu1 }
 0x168   : > { %v1476_v63 = vsel %vm1367_vm5, %v1438_v62, 0.0  ;;  %v1249_v33 = vsel %vm1144_vm6, %v1211_v32, 0.0  ;;  %v1182_v40 = vsel %vm1144_vm6, %v1142_v52, 0.0  ;;  %v1212_v50 = vmul.f32 %v1851_v30, %v1142_v52  ;;  %v1778_v14 = vpop.f32.mrb[41].mxu1  ;;  %v970_v7 = vpop.f32.mrb[40].mxu0 }
 0x169   : > { %v1477_v44 = vadd.f32 %v1476_v63, %v1475_v4  ;;  %v1406_v37 = vadd.f32 %v1405_v35, %v1404_v59  ;;  %v1478_v21 = vsel %vm1367_vm5, %v1439_v3, 0.0  ;;  %v1250_v47 = vadd.f32 %v1249_v33, %v1248_v23  ;;  %v705_v49 = vpop.f32.mrb[42].mxu1  ;;  %v1826_v16 = vpop.f32.mrb[41].mxu0 }
 0x16a   : > { %v1183_v43 = vadd.f32 %v1182_v40, %v1181_v39  ;;  %v1251_v18 = vsel %vm1144_vm6, %v1212_v50, 0.0  ;;  %v1852_v58 = vadd.f32 %v970_v7, %v702_v29  ;;  %v1779_v0 = vpop.f32.mrb[43].mxu1  ;;  %v973_v61 = vpop.f32.mrb[42].mxu0 }
 0x16b   : > { %v1479_v5 = vadd.f32 %v1478_v21, %v1477_v44  ;;  %v1252_v6 = vadd.f32 %v1251_v18, %v1250_v47  ;;  %v1827_v10 = vpop.f32.mrb[43].mxu0 }
 0x16c   : > { %v1366_v24 = vmul.f32 %v1852_v58, %v2464_v45  ;;  %v1143_v19 = vmul.f32 %v1852_v58, %v1121_v11 }
 0x16e   : > { %v1407_v1 = vsel %vm1367_vm5, %v1366_v24, 0.0  ;;  %v1440_v26 = vmul.f32 %v1852_v58, %v1366_v24  ;;  %v1184_v36 = vsel %vm1144_vm6, %v1143_v19, 0.0  ;;  %v1213_v34 = vmul.f32 %v1852_v58, %v1143_v19 }
 0x16f   : > { %v1185_v2 = vadd.f32 %v1184_v36, %v1183_v43  ;;  %v1408_v42 = vadd.f32 %v1407_v1, %v1406_v37 }
 0x170   : > { %v1480_v25 = vsel %vm1367_vm5, %v1440_v26, 0.0  ;;  %v1253_v48 = vsel %vm1144_vm6, %v1213_v34, 0.0 }
 0x171   : > { %v1254_v27 = vadd.f32 %v1253_v48, %v1252_v6  ;;  %v1409_v46 = vrot.slane %v1408_v42, 4  ;;  %v1481_v41 = vadd.f32 %v1480_v25, %v1479_v5  ;;  %v1186_v38 = vrot.slane %v1185_v2, 4 }
 0x173   : > { %v1410_v54 = vadd.f32 %v1409_v46, %v1408_v42  ;;  %v1482_v53 = vrot.slane %v1481_v41, 4  ;;  %v1255_v51 = vrot.slane %v1254_v27, 4  ;;  %v1187_v52 = vadd.f32 %v1186_v38, %v1185_v2 }
 0x175   : > { %v1411_v57 = vrot.slane %v1410_v54, 2  ;;  %v1483_v45 = vadd.f32 %v1482_v53, %v1481_v41  ;;  %v1256_v13 = vadd.f32 %v1255_v51, %v1254_v27  ;;  %v1188_v15 = vrot.slane %v1187_v52, 2 }
 0x177   : > { %v1412_v55 = vadd.f32 %v1411_v57, %v1410_v54  ;;  %v1484_v12 = vrot.slane %v1483_v45, 2  ;;  %v1257_v4 = vrot.slane %v1256_v13, 2  ;;  %v1189_v62 = vadd.f32 %v1188_v15, %v1187_v52 }
 0x179   : > { %v1413_v56 = vrot.slane %v1412_v55, 1  ;;  %v1485_v22 = vadd.f32 %v1484_v12, %v1483_v45  ;;  %v1258_v23 = vadd.f32 %v1257_v4, %v1256_v13  ;;  %v1190_v17 = vrot.slane %v1189_v62, 1 }
 0x17b   : > { %v1414_v60 = vadd.f32 %v1413_v56, %v1412_v55  ;;  %v1486_v20 = vrot.slane %v1485_v22, 1  ;;  %v1259_v30 = vrot.slane %v1258_v23, 1  ;;  %v1191_v59 = vadd.f32 %v1190_v17, %v1189_v62 }
 0x17d   : > { %1416 = vrot.lane.b32.xlu0 %v1414_v60, %s1967_s9  ;;  %v1487_v8 = vadd.f32 %v1486_v20, %v1485_v22  ;;  %v1260_v28 = vadd.f32 %v1259_v30, %v1258_v23 }
 0x17f   : > { %1489 = vrot.lane.b32.xlu1 %v1487_v8, %s1967_s9 }
 0x1ef   : > { %v1417_v32 = vpop.permute.xlu0 %1416 }
 0x1f0   : > { %v1419_v35 = vadd.f32 %v1417_v32, %v1191_v59 }
 0x1f1   : > { %v1490_v31 = vpop.permute.xlu1 %1489 }
 0x1f2   : > { %v1492_v9 = vadd.f32 %v1490_v31, %v1260_v28 }
 0x1f4   : > { %1494 = vrot.lane.b32.xlu1 %v1492_v9, %s1967_s9 }
 0x266   : > { %v1495_v3 = vpop.permute.xlu1 %1494 }
 0x267   : > { %v1497_v39 = vsel %vm1144_vm6, %v1419_v35, %v1495_v3 }
 0x268   : > { %1498 = vst [vmem:[%s188_s13] sm:$0x1] %v1497_v39 }
 0x269 PF: > { %s13_s12 = sadd.s32 1, %s1961_s12  }
 0x26a   : > { %p10_p5 = scmp.ge.s32.totalorder %s13_s12, 4  }
 0x26c   :  { %12 = sbr.rel (!%p10_p5) target bundleno = 1 (0x1), region = 67 }

// kernel: stem_forward.3
= control target key start
LH: loop header
LB: loop body
LE: loop exit
PB: predicated region body
PF: predicated region fallthrough
CT: control target
= control target key end

     0   :  { %s1530_s12 = smov 0   ;;  %s1917_s0 = inlined_call_operand.vmem [shape: bf16[2,186,24], index: 0, kind: input, shape index: {}]   ;;  %s1918_s1 = inlined_call_operand.vmem [shape: bf16[3,24,128], index: 1, kind: input, shape index: {}]   ;;  %s1919_s2 = inlined_call_operand.vmem [shape: f32[2,128], index: 2, kind: input, shape index: {}]   ;;  %s1920_s3 = inlined_call_operand.vmem [shape: f32[336,128], index: 3, kind: output, shape index: {}]  }
   0x1 LB: > { %s1536_s13 = sadd.s32 4294967295, %s1506_s12   ;;  %p1113_p0 = scmp.ge.s32.totalorder %s1506_s12, 1  ;;  %s1506_s12 = sphi %s1530_s12, %s13_s12  }
   0x2   : > { %p137_p1 = scmp.lt.s32.totalorder %s1506_s12, 3 }
   0x4   : > { %p138_p2 = pnand %p1113_p0, %p137_p1 }
   0x5   : > { %v1461_v0 = vld [vmem:[%s1918_s1] sm:$0xff] (!%p138_p2)   ;;  %v1508_v1 = vmov (!%p138_p2), 0.0   ;;  %vm389_vm0 = vcmask (!%p138_p2), 1043456   ;;  %v1462_v2 = vld [vmem:[%s1918_s1 + $0x8] ss:$0 sps:$4 sm:$0xff] (!%p138_p2)   ;;  %vm1509_vm1 = vmmov (!%p138_p2), 0  }
   0x6   : > { %141 = sbr.rel (%p138_p2) target bundleno = 368 (0x170), region = 32  ;;  %1285 = vmatprep.subr.bf16.mxu0 (!%p138_p2), %v1508_v1  ;;  %1237 = vmatprep.subr.bf16.mxu1 (!%p138_p2), %v1508_v1  ;;  %v1463_v3 = vld [vmem:[%s1918_s1 + $0xc] sm:$0xff] (!%p138_p2)   ;;  %p161_p3 = scmp.lt.s32.totalorder (!%p138_p2), %s1536_s13, 1  ;;  %v1556_v4 = vsel (!%p138_p2), %vm389_vm0, %v1462_v2, 0  ;;  %v1467_v5 = vld [vmem:[%s1918_s1 + $0x14] ss:$0 sps:$4 sm:$0xff] (!%p138_p2)  }
   0x7   : > { %1286 = vmatpush3.bf16.msra.mxu0 (!%p138_p2), %v1461_v0  ;;  %1289 = vmatprep.mubr.msk.bf16.mxu0 (!%p138_p2), %vm1509_vm1, %v1508_v1  ;;  %v391_v6 = vsel (!%p138_p2), %vm389_vm0, %v1467_v5, 0  ;;  %vm355_vm2 = vcmask (!%p138_p2), 195584   ;;  %v1466_v7 = vld [vmem:[%s1918_s1 + $0x18] sm:$0xff] (!%p138_p2)   ;;  %v1474_v8 = vld [vmem:[%s1918_s1 + $0x20] ss:$0 sps:$4 sm:$0xff] (!%p138_p2)   ;;  %vm772_vm4 = vcmask (!%p138_p2), 1046528  }
   0x8   : > { %1287 = vmatprep.subr.bf16.mxu0 (!%p138_p2), %v1508_v1  ;;  %1241 = vmatprep.mubr.msk.bf16.mxu1 (!%p138_p2), %vm1509_vm1, %v1508_v1  ;;  %v837_v24 = vsel (!%p138_p2), %vm389_vm0, %v1474_v8, 0  ;;  %vm258_vm3 = vsmask.f32 (!%p138_p2), 7424  ;;  %s166_s4 = smul.u32 (!%p138_p2), 21, %s1536_s13 }
   0x9   : > { %1238 = vmatpush3.bf16.msra.mxu1 (!%p138_p2), %v1463_v3 }
   0xa   : > { %1239 = vmatprep.subr.bf16.mxu1 (!%p138_p2), %v1508_v1  ;;  %p167_p4 = scmp.lt.s32.totalorder (!%p138_p2), %s166_s4, 41 }
   0xb   : > { %1288 = vmatpush3.bf16.msra.mxu0 (!%p138_p2), %v1556_v4 }
   0xc   : > { %1333 = vmatprep.subr.bf16.mxu0 (!%p138_p2), %v1508_v1 }
   0xd   : > { %s162_s20 = scalar_select %p161_p3, %s1536_s13, 1  ;;  %1240 = vmatpush3.bf16.msra.mxu1 %v391_v6 }
   0xe   : > { %1381 = vmatprep.subr.bf16.mxu1 %v1508_v1  ;;  %s1922_s4 = smov (!%p167_p4, %s166_s4), 41 }
   0xf   : > { %s1450_s23 = smul.u32 96, %s162_s20  ;;  %s1115_s7 = sshll.u32 %s1922_s4, 3 }
  0x10   : > { %s1846_s13 = scalar_lea.vmem %s1920_s3, %s1115_s7 }
  0x11   : > { %s1571_s26 = scalar_lea.vmem %s1917_s0, %s1450_s23 }
  0x12   : > { %v173_v9 = vld [vmem:[%s1571_s26] sm:$0xf]  ;;  %v174_v10 = vld [vmem:[%s1571_s26 + $0x4] sm:$0xf]  ;;  %v175_v11 = vld [vmem:[%s1571_s26 + $0x8] sm:$0xf] }
  0x13   : > { %v1119_v12 = vcombine.low %v174_v10, %v175_v11  ;;  %v1143_v13 = vcombine.low %v173_v9, %v174_v10  ;;  %v176_v14 = vld [vmem:[%s1571_s26 + $0xc] sm:$0xf]  ;;  %v177_v15 = vld [vmem:[%s1571_s26 + $0x10] sm:$0xf]  ;;  %v178_v16 = vld [vmem:[%s1571_s26 + $0x14] sm:$0xf] }
  0x14   : > { %v1120_v17 = vcombine.low %v176_v14, %v177_v15  ;;  %v1587_v18 = vld [vmem:[%s1571_s26 + $0x18] sm:$0xf]  ;;  %v1596_v26 = vld [vmem:[%s1571_s26 + $0x1c] sm:$0xf]  ;;  %v1144_v28 = vcombine.low %v175_v11, %v176_v14  ;;  %v1599_v31 = vld [vmem:[%s1571_s26 + $0x20] sm:$0xf]  ;;  %v1145_v39 = vcombine.low %v177_v15, %v178_v16 }
  0x15   : > { %1290 = vmatmul.mubr.msk.bf16.vlgmr.msra.gmra.mrb[0].mxu0 %vm355_vm2, %v1143_v13  ;;  %v260_v19 = vshrl.u32 %v1119_v12, 16  ;;  %v262_v20 = vshll.u32 %v1119_v12, 16  ;;  %v1121_v21 = vcombine.low %v178_v16, %v1587_v18  ;;  %v1122_v35 = vcombine.low %v1596_v26, %v1599_v31  ;;  %v1607_v36 = vld [vmem:[%s1571_s26 + $0x44] sm:$0xf]  ;;  %v1614_v37 = vld [vmem:[%s1571_s26 + $0x48] sm:$0xf] }
  0x16   : > { %1334 = vmatpush3.bf16.msra.mxu0 %v1466_v7  ;;  %v267_v22 = vshll.u32 %v1120_v17, 16  ;;  %1293 = vmatprep.mubr.msk.bf16.mxu0 %vm1509_vm1, %v1508_v1  ;;  %v271_v29 = vshrl.u32 %v1120_v17, 16  ;;  %v182_v38 = vld [vmem:[%s1571_s26 + $0x24] sm:$0xf]  ;;  %v1619_v40 = vld [vmem:[%s1571_s26 + $0x28] sm:$0xf]  ;;  %v1127_v41 = vcombine.low %v1607_v36, %v1614_v37 }
  0x17   : > { %v264_v23 = vrot.slane %v262_v20, 1  ;;  %1335 = vmatprep.subr.bf16.mxu0 %v1508_v1  ;;  %v275_v30 = vshll.u32 %v1121_v21, 16  ;;  %v1624_v42 = vld [vmem:[%s1571_s26 + $0x4c] sm:$0xf]  ;;  %v1627_v43 = vld [vmem:[%s1571_s26 + $0x50] sm:$0xf]  ;;  %v1123_v52 = vcombine.low %v182_v38, %v1619_v40 }
  0x18   : > { %v269_v25 = vrot.slane %v267_v22, 1  ;;  %v279_v45 = vshrl.u32 %v1121_v21, 16  ;;  %v283_v46 = vshll.u32 %v1122_v35, 16  ;;  %v1128_v47 = vcombine.low %v1624_v42, %v1627_v43  ;;  %v1634_v51 = vld [vmem:[%s1571_s26 + $0x54] sm:$0x1f]   ;;  %v1654_v2 = vld [vmem:[%s1571_s26 + $0x48] sm:$0xff]  }
  0x19   : > { %v265_v27 = vor.u32 %v264_v23, %v260_v19  ;;  %v277_v34 = vrot.slane %v275_v30, 1  ;;  %v323_v48 = vshll.u32 %v1127_v41, 16  ;;  %v327_v49 = vshrl.u32 %v1127_v41, 16  ;;  %v184_v63 = vld [vmem:[%s1571_s26 + $0x2c] sm:$0xf]  ;;  %v1496_v7 = vld [vmem:[%s1571_s26 + $0x50] sm:$0xff]  }
  0x1a   : > { %1336 = vmatpush3.bf16.msra.mxu0 %v837_v24  ;;  %v273_v33 = vor.u32 %v271_v29, %v269_v25  ;;  %v331_v50 = vshll.u32 %v1128_v47, 16  ;;  %v335_v54 = vshrl.u32 %v1128_v47, 16  ;;  %v285_v56 = vrot.slane %v283_v46, 1  ;;  %v1665_v8 = vld [vmem:[%s1571_s26 + $0x30] sm:$0xf] }
  0x1b   : > { %v270_v32 = vsel %vm258_vm3, %v265_v27, %v269_v25  ;;  %v1638_v53 = vrot.slane %v323_v48, 1  ;;  %v281_v55 = vor.u32 %v279_v45, %v277_v34  ;;  %v339_v58 = vshll.u32 %v1634_v51, 16  ;;  %v1668_v9 = vld [vmem:[%s1571_s26 + $0x58] sm:$0x1f]   ;;  %v1692_v22 = vld [vmem:[%s1571_s26 + $0x34] sm:$0xf] }
  0x1c   : > { %1242 = vmatmul.mubr.msk.bf16.vlgmr.msra.gmra.mrb[0].mxu1 %vm355_vm2, %v270_v32  ;;  %v278_v44 = vsel %vm258_vm3, %v273_v33, %v277_v34  ;;  %v333_v57 = vrot.slane %v331_v50, 1  ;;  %v287_v62 = vshrl.u32 %v1122_v35, 16  ;;  %v291_v5 = vshll.u32 %v1123_v52, 16  ;;  %v1695_v23 = vld [vmem:[%s1571_s26 + $0x38] sm:$0xf] }
  0x1d   : > { %1294 = vmatmul.mubr.msk.bf16.gmra.mrb[4].mxu0 %vm355_vm2, %v1144_v28  ;;  %1383 = vmatpush3.bf16.msra.mxu1 %v1461_v0  ;;  %v329_v59 = vor.u32 %v327_v49, %v1638_v53  ;;  %v1647_v61 = vrot.slane %v339_v58, 1  ;;  %v286_v3 = vsel %vm258_vm3, %v281_v55, %v285_v56  ;;  %v788_v10 = vrot.slane %v1654_v2, 1  ;;  %v1481_v32 = vld [vmem:[%s1571_s26 + $0x8] sm:$0xfe]   ;;  %v1710_v33 = vld [vmem:[%s1571_s26 + $0x3c] sm:$0xf] }
  0x1e   : > { %1245 = vmatprep.mubr.msk.bf16.mxu1 %vm1509_vm1, %v1508_v1  ;;  %1297 = vmatprep.mubr.msk.bf16.mxu0 %vm1509_vm1, %v1508_v1  ;;  %v337_v60 = vor.u32 %v335_v54, %v333_v57  ;;  %v790_v11 = vrot.slane %v1496_v7, 1  ;;  %v792_v12 = vrot.slane %v1668_v9, 1  ;;  %v289_v13 = vor.u32 %v287_v62, %v285_v56  ;;  %v1713_v34 = vld [vmem:[%s1571_s26 + $0x40] sm:$0xf]  ;;  %v1484_v48 = vld [vmem:[%s1571_s26 + $0x18] sm:$0xff]  }
  0x1f   : > { %1382 = vmatprep.subr.bf16.mxu1 %v1508_v1  ;;  %v1651_v0 = vsel %vm258_vm3, %v329_v59, %v333_v57  ;;  %v293_v14 = vrot.slane %v291_v5, 1  ;;  %v1124_v15 = vcombine.low %v184_v63, %v1665_v8  ;;  %v1147_v19 = vcombine.low %v1599_v31, %v182_v38  ;;  %v1482_v31 = vld [vmem:[%s1571_s26 + $0x10] sm:$0xff]   ;;  %v1486_v57 = vld [vmem:[%s1571_s26 + $0x20] sm:$0xff]  }
  0x20   : > { %v1661_v6 = vsel %vm258_vm3, %v337_v60, %v1647_v61  ;;  %v1680_v16 = vsel %vm772_vm4, %v788_v10, %v790_v11  ;;  %v1687_v17 = vsel %vm772_vm4, %v790_v11, %v792_v12  ;;  %v295_v20 = vshrl.u32 %v1123_v52, 16  ;;  %v1490_v5 = vld [vmem:[%s1571_s26 + $0x30] sm:$0xff]   ;;  %v1491_v11 = vld [vmem:[%s1571_s26 + $0x38] sm:$0xff]  }
  0x21   : > { %1384 = vmatpush3.bf16.msra.mxu1 %v1556_v4  ;;  %v1146_v4 = vcombine.low %v1587_v18, %v1596_v26  ;;  %v294_v18 = vsel %vm258_vm3, %v289_v13, %v293_v14  ;;  %v299_v21 = vshll.u32 %v1124_v15, 16  ;;  %v1125_v26 = vcombine.low %v1692_v22, %v1695_v23 }
  0x22   : > { %v297_v24 = vor.u32 %v295_v20, %v293_v14  ;;  %v1148_v28 = vcombine.low %v1619_v40, %v184_v63  ;;  %v303_v29 = vshrl.u32 %v1124_v15, 16  ;;  %v773_v40 = vrot.slane %v1481_v32, 1  ;;  %v1488_v63 = vld [vmem:[%s1571_s26 + $0x28] sm:$0xff]  }
  0x23   : > { %v301_v25 = vrot.slane %v299_v21, 1  ;;  %v307_v30 = vshll.u32 %v1125_v26, 16  ;;  %v774_v41 = vrot.slane %v1482_v31, 1  ;;  %v311_v45 = vshrl.u32 %v1125_v26, 16 }
  0x24   : > { %1246 = vmatmul.mubr.msk.bf16.gmra.mrb[4].mxu1 %vm355_vm2, %v278_v44  ;;  %v776_v52 = vrot.slane %v1484_v48, 1  ;;  %v778_v59 = vrot.slane %v1486_v57, 1  ;;  %v343_v13 = vshrl.u32 %v1634_v51, 16  ;;  %v1152_v2 = vcombine.low %v1614_v37, %v1624_v42 }
  0x25   : > { %1298 = vmatmul.mubr.msk.bf16.gmra.mrb[8].mxu0 %vm355_vm2, %v1145_v39  ;;  %1249 = vmatprep.mubr.msk.bf16.mxu1 %vm1509_vm1, %v1508_v1  ;;  %v302_v27 = vsel %vm258_vm3, %v297_v24, %v301_v25  ;;  %v305_v35 = vor.u32 %v303_v29, %v301_v25  ;;  %v309_v38 = vrot.slane %v307_v30, 1  ;;  %v1126_v39 = vcombine.low %v1710_v33, %v1713_v34 }
  0x26   : > { %1301 = vmatprep.mubr.msk.bf16.mxu0 %vm1509_vm1, %v1508_v1  ;;  %v775_v47 = vsel %vm772_vm4, %v773_v40, %v774_v41  ;;  %v777_v56 = vsel %vm772_vm4, %v774_v41, %v776_v52  ;;  %v779_v62 = vsel %vm772_vm4, %v776_v52, %v778_v59  ;;  %v345_v14 = vor.u32 %v343_v13, %v1647_v61  ;;  %v1840_v41 = vld [vmem:[%s1919_s2 + $0x1] ss:$0 sm:$0xff] }
  0x27   : > { %v310_v44 = vsel %vm258_vm3, %v305_v35, %v309_v38  ;;  %v315_v46 = vshll.u32 %v1126_v39, 16  ;;  %v313_v49 = vor.u32 %v311_v45, %v309_v38  ;;  %v319_v55 = vshrl.u32 %v1126_v39, 16  ;;  %v1833_v35 = vld [vmem:[%s1919_s2] ss:$0 sm:$0xff] }
  0x28   : > { %v1150_v61 = vcombine.low %v1695_v23, %v1710_v33 }
  0x29   : > { %v317_v50 = vrot.slane %v315_v46, 1 }
  0x2b   : > { %v318_v54 = vsel %vm258_vm3, %v313_v49, %v317_v50  ;;  %v321_v58 = vor.u32 %v319_v55, %v317_v50 }
  0x2c   : > { %1250 = vmatmul.mubr.msk.bf16.gmra.mrb[8].mxu1 %vm355_vm2, %v286_v3  ;;  %v780_v3 = vrot.slane %v1488_v63, 1 }
  0x2d   : > { %1302 = vmatmul.mubr.msk.bf16.gmra.mrb[12].mxu0 %vm355_vm2, %v1146_v4  ;;  %1253 = vmatprep.mubr.msk.bf16.mxu1 %vm1509_vm1, %v1508_v1  ;;  %v326_v60 = vsel %vm258_vm3, %v321_v58, %v1638_v53  ;;  %v782_v53 = vrot.slane %v1490_v5, 1 }
  0x2e   : > { %1305 = vmatprep.mubr.msk.bf16.mxu0 %vm1509_vm1, %v1508_v1  ;;  %v781_v4 = vsel %vm772_vm4, %v778_v59, %v780_v3 }
  0x2f   : > { %v783_v7 = vsel %vm772_vm4, %v780_v3, %v782_v53 }
  0x34   : > { %1254 = vmatmul.mubr.msk.bf16.gmra.mrb[12].mxu1 %vm355_vm2, %v294_v18  ;;  %v1492_v18 = vld [vmem:[%s1571_s26 + $0x40] sm:$0xff]  }
  0x35   : > { %1306 = vmatmul.mubr.msk.bf16.gmra.mrb[16].mxu0 %vm355_vm2, %v1147_v19  ;;  %1257 = vmatprep.mubr.msk.bf16.mxu1 %vm1509_vm1, %v1508_v1  ;;  %v786_v51 = vrot.slane %v1492_v18, 1 }
  0x36   : > { %1309 = vmatprep.mubr.msk.bf16.mxu0 %vm1509_vm1, %v1508_v1 }
  0x37   : > { %v789_v20 = vsel %vm772_vm4, %v786_v51, %v788_v10 }
  0x3c   : > { %1258 = vmatmul.mubr.msk.bf16.gmra.mrb[16].mxu1 %vm355_vm2, %v302_v27 }
  0x3d   : > { %1310 = vmatmul.mubr.msk.bf16.gmra.mrb[20].mxu0 %vm355_vm2, %v1148_v28  ;;  %1261 = vmatprep.mubr.msk.bf16.mxu1 %vm1509_vm1, %v1508_v1 }
  0x3e   : > { %1337 = vmatprep.mubr.msk.bf16.mxu0 %vm1509_vm1, %v1508_v1 }
  0x44   : > { %1262 = vmatmul.mubr.msk.bf16.gmra.mrb[20].mxu1 %vm355_vm2, %v310_v44 }
  0x45   : > { %1338 = vmatmul.mubr.msk.bf16.vlgmr.msra.gmra.mrb[0].mxu0 %vm355_vm2, %v775_v47  ;;  %1265 = vmatprep.mubr.msk.bf16.mxu1 %vm1509_vm1, %v1508_v1 }
  0x46   : > { %1341 = vmatprep.mubr.msk.bf16.mxu0 %vm1509_vm1, %v1508_v1 }
  0x4c   : > { %1266 = vmatmul.mubr.msk.bf16.gmra.mrb[24].mxu1 %vm355_vm2, %v318_v54 }
  0x4d   : > { %1342 = vmatmul.mubr.msk.bf16.gmra.mrb[4].mxu0 %vm355_vm2, %v777_v56  ;;  %1269 = vmatprep.mubr.msk.bf16.mxu1 %vm1509_vm1, %v1508_v1 }
  0x4e   : > { %1345 = vmatprep.mubr.msk.bf16.mxu0 %vm1509_vm1, %v1508_v1 }
  0x54   : > { %1270 = vmatmul.mubr.msk.bf16.gmra.mrb[28].mxu1 %vm355_vm2, %v326_v60 }
  0x55   : > { %1346 = vmatmul.mubr.msk.bf16.gmra.mrb[8].mxu0 %vm355_vm2, %v779_v62  ;;  %1273 = vmatprep.mubr.msk.bf16.mxu1 %vm1509_vm1, %v1508_v1 }
  0x56   : > { %1349 = vmatprep.mubr.msk.bf16.mxu0 %vm1509_vm1, %v1508_v1 }
  0x5c   : > { %1274 = vmatmul.mubr.msk.bf16.gmra.mrb[32].mxu1 %vm355_vm2, %v1651_v0  ;;  %v784_v0 = vrot.slane %v1491_v11, 1 }
  0x5d   : > { %1350 = vmatmul.mubr.msk.bf16.gmra.mrb[12].mxu0 %vm355_vm2, %v781_v4  ;;  %1277 = vmatprep.mubr.msk.bf16.mxu1 %vm1509_vm1, %v1508_v1 }
  0x5e   : > { %1353 = vmatprep.mubr.msk.bf16.mxu0 %vm1509_vm1, %v1508_v1  ;;  %v785_v15 = vsel %vm772_vm4, %v782_v53, %v784_v0  ;;  %v787_v19 = vsel %vm772_vm4, %v784_v0, %v786_v51 }
  0x64   : > { %1278 = vmatmul.mubr.msk.bf16.gmra.mrb[36].mxu1 %vm355_vm2, %v1661_v6  ;;  %v1149_v6 = vcombine.low %v1665_v8, %v1692_v22  ;;  %v1151_v8 = vcombine.low %v1713_v34, %v1607_v36  ;;  %v1153_v36 = vcombine.low %v1627_v43, %v1627_v43 }
  0x65   : > { %1354 = vmatmul.mubr.msk.bf16.gmra.mrb[16].mxu0 %vm355_vm2, %v783_v7  ;;  %1281 = vmatprep.mubr.msk.bf16.mxu1 %vm1509_vm1, %v1508_v1 }
  0x66   : > { %1357 = vmatprep.mubr.msk.bf16.mxu0 %vm1509_vm1, %v1508_v1 }
  0x6c   : > { %1282 = vmatmul.mubr.msk.bf16.gmra.mrb[40].mxu1 %vm355_vm2, %v345_v14 }
  0x6d   : > { %1358 = vmatmul.mubr.msk.bf16.gmra.mrb[20].mxu0 %vm355_vm2, %v785_v15  ;;  %1313 = vmatprep.mubr.msk.bf16.mxu1 %vm1509_vm1, %v1508_v1 }
  0x6e   : > { %1361 = vmatprep.mubr.msk.bf16.mxu0 %vm1509_vm1, %v1508_v1 }
  0x74   : > { %1314 = vmatmul.mubr.msk.bf16.vlgmr.msra.gmra.mrb[24].mxu1 %vm355_vm2, %v1149_v6 }
  0x75   : > { %1362 = vmatmul.mubr.msk.bf16.gmra.mrb[24].mxu0 %vm355_vm2, %v787_v19  ;;  %1317 = vmatprep.mubr.msk.bf16.mxu1 %vm1509_vm1, %v1508_v1 }
  0x76   : > { %1365 = vmatprep.mubr.msk.bf16.mxu0 %vm1509_vm1, %v1508_v1 }
  0x7c   : > { %1318 = vmatmul.mubr.msk.bf16.gmra.mrb[28].mxu1 %vm355_vm2, %v1150_v61 }
  0x7d   : > { %1366 = vmatmul.mubr.msk.bf16.gmra.mrb[28].mxu0 %vm355_vm2, %v789_v20  ;;  %1321 = vmatprep.mubr.msk.bf16.mxu1 %vm1509_vm1, %v1508_v1 }
  0x7e   : > { %1369 = vmatprep.mubr.msk.bf16.mxu0 %vm1509_vm1, %v1508_v1 }
  0x84   : > { %1322 = vmatmul.mubr.msk.bf16.gmra.mrb[32].mxu1 %vm355_vm2, %v1151_v8 }
  0x85   : > { %1370 = vmatmul.mubr.msk.bf16.gmra.mrb[32].mxu0 %vm355_vm2, %v1680_v16  ;;  %1325 = vmatprep.mubr.msk.bf16.mxu1 %vm1509_vm1, %v1508_v1 }
  0x86   : > { %1373 = vmatprep.mubr.msk.bf16.mxu0 %vm1509_vm1, %v1508_v1 }
  0x8c   : > { %1326 = vmatmul.mubr.msk.bf16.gmra.mrb[36].mxu1 %vm355_vm2, %v1152_v2 }
  0x8d   : > { %1374 = vmatmul.mubr.msk.bf16.gmra.mrb[36].mxu0 %vm355_vm2, %v1687_v17  ;;  %1329 = vmatprep.mubr.msk.bf16.mxu1 %vm1509_vm1, %v1508_v1 }
  0x8e   : > { %1377 = vmatprep.mubr.msk.bf16.mxu0 %vm1509_vm1, %v1508_v1 }
  0x94   : > { %1330 = vmatmul.mubr.msk.bf16.gmra.mrb[40].mxu1 %vm355_vm2, %v1153_v36 }
  0x95   : > { %1378 = vmatmul.mubr.msk.bf16.gmra.mrb[40].mxu0 %vm355_vm2, %v792_v12 }
  0xef   : > { %v427_v37 = vpop.f32.mrb[0].mxu1 }
  0xf0   : > { %v1243_v42 = vpop.f32.mrb[1].mxu1 }
  0xf1   : > { %v430_v10 = vpop.f32.mrb[2].mxu1 }
  0xf2   : > { %v1244_v16 = vpop.f32.mrb[3].mxu1 }
  0xf7   : > { %v435_v17 = vpop.f32.mrb[4].mxu1 }
  0xf8   : > { %v1247_v21 = vpop.f32.mrb[5].mxu1 }
  0xf9   : > { %v438_v22 = vpop.f32.mrb[6].mxu1 }
  0xfa   : > { %v1248_v23 = vpop.f32.mrb[7].mxu1 }
  0xff   : > { %v443_v24 = vpop.f32.mrb[8].mxu1 }
 0x100   : > { %v1251_v1 = vpop.f32.mrb[9].mxu1 }
 0x101   : > { %v446_v25 = vpop.f32.mrb[10].mxu1 }
 0x102   : > { %v1252_v26 = vpop.f32.mrb[11].mxu1 }
 0x107   : > { %v451_v43 = vpop.f32.mrb[12].mxu1 }
 0x108   : > { %v1255_v27 = vpop.f32.mrb[13].mxu1 }
 0x109   : > { %v454_v28 = vpop.f32.mrb[14].mxu1 }
 0x10a   : > { %v1256_v29 = vpop.f32.mrb[15].mxu1 }
 0x10f   : > { %v1824_v9 = vpop.f32.mrb[16].mxu1 }
 0x110   : > { %v1259_v12 = vpop.f32.mrb[17].mxu1 }
 0x111   : > { %v1826_v30 = vpop.f32.mrb[18].mxu1 }
 0x112   : > { %v1260_v31 = vpop.f32.mrb[19].mxu1 }
 0x117   : > { %v1828_v32 = vpop.f32.mrb[20].mxu1 }
 0x118   : > { %v1263_v33 = vpop.f32.mrb[21].mxu1  ;;  %v873_v34 = vpop.f32.mrb[0].mxu0 }
 0x119   : > { %v1385_v38 = vadd.f32 %v873_v34, %v427_v37  ;;  %v1835_v39 = vpop.f32.mrb[22].mxu1  ;;  %v1339_v40 = vpop.f32.mrb[1].mxu0 }
 0x11a   : > { %v1264_v44 = vpop.f32.mrb[23].mxu1  ;;  %v876_v45 = vpop.f32.mrb[2].mxu0 }
 0x11b   : > { %v985_v46 = vmul.f32 %v1385_v38, %v1833_v35  ;;  %v1386_v47 = vadd.f32 %v876_v45, %v430_v10  ;;  %v1340_v48 = vpop.f32.mrb[3].mxu0 }
 0x11d   : > { %v1011_v49 = vadd.f32 %v1840_v41, %v985_v46  ;;  %v986_v50 = vmul.f32 %v1386_v47, %v1833_v35 }
 0x11f   : > { %1032 = vst [vmem:[%s1846_s13] sm:$0xff] %v1011_v49  ;;  %v1012_v52 = vadd.f32 %v1840_v41, %v986_v50 }
 0x120   : > { %v881_v54 = vpop.f32.mrb[4].mxu0 }
 0x121   : > { %1033 = vst [vmem:[%s1846_s13 + $0x8] sm:$0xff] %v1012_v52  ;;  %v1387_v55 = vadd.f32 %v881_v54, %v435_v17  ;;  %v1343_v56 = vpop.f32.mrb[5].mxu0 }
 0x122   : > { %v884_v57 = vpop.f32.mrb[6].mxu0 }
 0x123   : > { %v987_v58 = vmul.f32 %v1387_v55, %v1833_v35  ;;  %v1388_v59 = vadd.f32 %v884_v57, %v438_v22  ;;  %v1344_v60 = vpop.f32.mrb[7].mxu0 }
 0x125   : > { %v1013_v62 = vadd.f32 %v1840_v41, %v987_v58  ;;  %v988_v63 = vmul.f32 %v1388_v59, %v1833_v35 }
 0x127   : > { %1034 = vst [vmem:[%s1846_s13 + $0x10] sm:$0xff] %v1013_v62  ;;  %v1014_v3 = vadd.f32 %v1840_v41, %v988_v63 }
 0x128   : > { %v889_v4 = vpop.f32.mrb[8].mxu0 }
 0x129   : > { %1035 = vst [vmem:[%s1846_s13 + $0x18] sm:$0xff] %v1014_v3  ;;  %v1389_v5 = vadd.f32 %v889_v4, %v443_v24  ;;  %v1347_v53 = vpop.f32.mrb[9].mxu0 }
 0x12a   : > { %v892_v7 = vpop.f32.mrb[10].mxu0 }
 0x12b   : > { %v989_v11 = vmul.f32 %v1389_v5, %v1833_v35  ;;  %v1390_v13 = vadd.f32 %v892_v7, %v446_v25  ;;  %v1348_v0 = vpop.f32.mrb[11].mxu0 }
 0x12d   : > { %v1015_v14 = vadd.f32 %v1840_v41, %v989_v11  ;;  %v990_v15 = vmul.f32 %v1390_v13, %v1833_v35 }
 0x12f   : > { %1036 = vst [vmem:[%s1846_s13 + $0x20] sm:$0xff] %v1015_v14  ;;  %v1016_v18 = vadd.f32 %v1840_v41, %v990_v15 }
 0x130   : > { %v897_v51 = vpop.f32.mrb[12].mxu0 }
 0x131   : > { %1037 = vst [vmem:[%s1846_s13 + $0x28] sm:$0xff] %v1016_v18  ;;  %v1391_v6 = vadd.f32 %v897_v51, %v451_v43  ;;  %v1351_v19 = vpop.f32.mrb[13].mxu0 }
 0x132   : > { %v900_v61 = vpop.f32.mrb[14].mxu0 }
 0x133   : > { %v991_v20 = vmul.f32 %v1391_v6, %v1833_v35  ;;  %v1392_v8 = vadd.f32 %v900_v61, %v454_v28  ;;  %v1352_v2 = vpop.f32.mrb[15].mxu0 }
 0x135   : > { %v1017_v36 = vadd.f32 %v1840_v41, %v991_v20  ;;  %v992_v37 = vmul.f32 %v1392_v8, %v1833_v35 }
 0x137   : > { %1038 = vst [vmem:[%s1846_s13 + $0x30] sm:$0xff] %v1017_v36  ;;  %v1018_v42 = vadd.f32 %v1840_v41, %v992_v37 }
 0x138   : > { %v905_v10 = vpop.f32.mrb[16].mxu0 }
 0x139   : > { %1039 = vst [vmem:[%s1846_s13 + $0x38] sm:$0xff] %v1018_v42  ;;  %v1393_v16 = vadd.f32 %v905_v10, %v1824_v9  ;;  %v1355_v17 = vpop.f32.mrb[17].mxu0 }
 0x13a   : > { %v908_v21 = vpop.f32.mrb[18].mxu0 }
 0x13b   : > { %v993_v22 = vmul.f32 %v1393_v16, %v1833_v35  ;;  %v1394_v23 = vadd.f32 %v908_v21, %v1826_v30  ;;  %v1356_v24 = vpop.f32.mrb[19].mxu0 }
 0x13d   : > { %v1019_v1 = vadd.f32 %v1840_v41, %v993_v22  ;;  %v994_v25 = vmul.f32 %v1394_v23, %v1833_v35 }
 0x13f   : > { %1040 = vst [vmem:[%s1846_s13 + $0x40] sm:$0xff] %v1019_v1  ;;  %v1020_v26 = vadd.f32 %v1840_v41, %v994_v25 }
 0x140   : > { %v913_v43 = vpop.f32.mrb[20].mxu0 }
 0x141   : > { %1041 = vst [vmem:[%s1846_s13 + $0x48] sm:$0xff] %v1020_v26  ;;  %v1395_v27 = vadd.f32 %v913_v43, %v1828_v32  ;;  %v1359_v28 = vpop.f32.mrb[21].mxu0 }
 0x142   : > { %v916_v29 = vpop.f32.mrb[22].mxu0 }
 0x143   : > { %v995_v9 = vmul.f32 %v1395_v27, %v1833_v35  ;;  %v1396_v12 = vadd.f32 %v916_v29, %v1835_v39  ;;  %v1360_v30 = vpop.f32.mrb[23].mxu0 }
 0x145   : > { %v1021_v31 = vadd.f32 %v1840_v41, %v995_v9  ;;  %v996_v33 = vmul.f32 %v1396_v12, %v1833_v35 }
 0x147   : > { %1042 = vst [vmem:[%s1846_s13 + $0x50] sm:$0xff] %v1021_v31  ;;  %v1022_v34 = vadd.f32 %v1840_v41, %v996_v33  ;;  %v653_v38 = vpop.f32.mrb[24].mxu1 }
 0x148   : > { %v1315_v40 = vpop.f32.mrb[25].mxu1  ;;  %v921_v44 = vpop.f32.mrb[24].mxu0 }
 0x149   : > { %1043 = vst [vmem:[%s1846_s13 + $0x58] sm:$0xff] %v1022_v34  ;;  %v1397_v32 = vadd.f32 %v921_v44, %v653_v38  ;;  %v656_v45 = vpop.f32.mrb[26].mxu1  ;;  %v1363_v46 = vpop.f32.mrb[25].mxu0 }
 0x14a   : > { %v1316_v47 = vpop.f32.mrb[27].mxu1  ;;  %v924_v48 = vpop.f32.mrb[26].mxu0 }
 0x14b   : > { %v997_v39 = vmul.f32 %v1397_v32, %v1833_v35  ;;  %v1398_v49 = vadd.f32 %v924_v48, %v656_v45  ;;  %v1364_v50 = vpop.f32.mrb[27].mxu0 }
 0x14d   : > { %v1023_v52 = vadd.f32 %v1840_v41, %v997_v39  ;;  %v998_v54 = vmul.f32 %v1398_v49, %v1833_v35 }
 0x14f   : > { %1044 = vst [vmem:[%s1846_s13 + $0x60] sm:$0xff] %v1023_v52  ;;  %v1024_v55 = vadd.f32 %v1840_v41, %v998_v54  ;;  %v661_v56 = vpop.f32.mrb[28].mxu1 }
 0x150   : > { %v1319_v57 = vpop.f32.mrb[29].mxu1  ;;  %v929_v58 = vpop.f32.mrb[28].mxu0 }
 0x151   : > { %1045 = vst [vmem:[%s1846_s13 + $0x68] sm:$0xff] %v1024_v55  ;;  %v1399_v59 = vadd.f32 %v929_v58, %v661_v56  ;;  %v664_v60 = vpop.f32.mrb[30].mxu1  ;;  %v1367_v62 = vpop.f32.mrb[29].mxu0 }
 0x152   : > { %v1320_v63 = vpop.f32.mrb[31].mxu1  ;;  %v932_v3 = vpop.f32.mrb[30].mxu0 }
 0x153   : > { %v999_v4 = vmul.f32 %v1399_v59, %v1833_v35  ;;  %v1400_v5 = vadd.f32 %v932_v3, %v664_v60  ;;  %v1368_v53 = vpop.f32.mrb[31].mxu0 }
 0x155   : > { %v1025_v7 = vadd.f32 %v1840_v41, %v999_v4  ;;  %v1000_v11 = vmul.f32 %v1400_v5, %v1833_v35 }
 0x157   : > { %1046 = vst [vmem:[%s1846_s13 + $0x70] sm:$0xff] %v1025_v7  ;;  %v1026_v13 = vadd.f32 %v1840_v41, %v1000_v11  ;;  %v669_v0 = vpop.f32.mrb[32].mxu1 }
 0x158   : > { %v1323_v14 = vpop.f32.mrb[33].mxu1  ;;  %v937_v15 = vpop.f32.mrb[32].mxu0 }
 0x159   : > { %1047 = vst [vmem:[%s1846_s13 + $0x78] sm:$0xff] %v1026_v13  ;;  %v1401_v18 = vadd.f32 %v937_v15, %v669_v0  ;;  %v672_v51 = vpop.f32.mrb[34].mxu1  ;;  %v1371_v6 = vpop.f32.mrb[33].mxu0 }
 0x15a   : > { %v1324_v19 = vpop.f32.mrb[35].mxu1  ;;  %v940_v61 = vpop.f32.mrb[34].mxu0 }
 0x15b   : > { %v1001_v20 = vmul.f32 %v1401_v18, %v1833_v35  ;;  %v1402_v8 = vadd.f32 %v940_v61, %v672_v51  ;;  %v1372_v2 = vpop.f32.mrb[35].mxu0 }
 0x15d   : > { %v1027_v36 = vadd.f32 %v1840_v41, %v1001_v20  ;;  %v1002_v37 = vmul.f32 %v1402_v8, %v1833_v35 }
 0x15f   : > { %1048 = vst [vmem:[%s1846_s13 + $0x80] sm:$0xff] %v1027_v36  ;;  %v1028_v42 = vadd.f32 %v1840_v41, %v1002_v37  ;;  %v677_v10 = vpop.f32.mrb[36].mxu1 }
 0x160   : > { %v1327_v16 = vpop.f32.mrb[37].mxu1  ;;  %v945_v17 = vpop.f32.mrb[36].mxu0 }
 0x161   : > { %1049 = vst [vmem:[%s1846_s13 + $0x88] sm:$0xff] %v1028_v42  ;;  %v1403_v21 = vadd.f32 %v945_v17, %v677_v10  ;;  %v680_v22 = vpop.f32.mrb[38].mxu1  ;;  %v1375_v23 = vpop.f32.mrb[37].mxu0 }
 0x162   : > { %v1328_v24 = vpop.f32.mrb[39].mxu1  ;;  %v948_v1 = vpop.f32.mrb[38].mxu0 }
 0x163   : > { %v1003_v25 = vmul.f32 %v1403_v21, %v1833_v35  ;;  %v1404_v26 = vadd.f32 %v948_v1, %v680_v22  ;;  %v1376_v43 = vpop.f32.mrb[39].mxu0 }
 0x165   : > { %v1029_v27 = vadd.f32 %v1840_v41, %v1003_v25  ;;  %v1004_v28 = vmul.f32 %v1404_v26, %v1833_v35 }
 0x167   : > { %1050 = vst [vmem:[%s1846_s13 + $0x90] sm:$0xff] %v1029_v27  ;;  %v1030_v29 = vadd.f32 %v1840_v41, %v1004_v28  ;;  %v685_v9 = vpop.f32.mrb[40].mxu1 }
 0x168   : > { %v1331_v12 = vpop.f32.mrb[41].mxu1  ;;  %v953_v30 = vpop.f32.mrb[40].mxu0 }
 0x169   : > { %1051 = vst [vmem:[%s1846_s13 + $0x98] sm:$0xff] %v1030_v29  ;;  %v1405_v31 = vadd.f32 %v953_v30, %v685_v9  ;;  %v688_v33 = vpop.f32.mrb[42].mxu1  ;;  %v1379_v34 = vpop.f32.mrb[41].mxu0 }
 0x16a   : > { %v1332_v38 = vpop.f32.mrb[43].mxu1  ;;  %v956_v40 = vpop.f32.mrb[42].mxu0 }
 0x16b   : > { %v1005_v44 = vmul.f32 %v1405_v31, %v1833_v35  ;;  %v1380_v32 = vpop.f32.mrb[43].mxu0 }
 0x16d   : > { %v1031_v45 = vadd.f32 %v1840_v41, %v1005_v44 }
 0x16f   : > { %1052 = vst [vmem:[%s1846_s13 + $0xa0] sm:$0xff] %v1031_v45 }
 0x170 PF: > { %s13_s12 = sadd.s32 1, %s1506_s12  }
 0x171   : > { %p10_p5 = scmp.ge.s32.totalorder %s13_s12, 4  }
 0x173   :  { %12 = sbr.rel (!%p10_p5) target bundleno = 1 (0x1), region = 64 }

</bundles_post_ra>
